<compile_context>
chip_gen: v6e
topology: v6e:2x2x1
jax: 0.10.0
libtpu: 0.0.40
codegen_flags: <defaults>
</compile_context>

<pallas_src>
import math
from functools import partial

import numpy as np
import jax
import jax.numpy as jnp
from jax.experimental import pallas as pl
from jax.experimental.pallas import tpu as pltpu


# -----------------------------------------------------------------------------
# Constants / small helpers
# -----------------------------------------------------------------------------
_NEG_INF_INIT = -1e30   # online-softmax running-max initializer
_MASK_VALUE = -2e30     # key-mask value: strictly below the init, so exp(mask - m)
                        # underflows to 0 even when a whole first kv tile is masked
_VMEM_LIMIT = 48 * 1024 * 1024


def _row_tile(n, max_tile=1024):
    # Full-array block when small (always layout-legal), 1024-row tiles when large
    # (multiple of 8 -> legal; enables pipelining with low per-step overhead).
    return n if n <= max_tile else max_tile


def _ffn_row_tile(n, f):
    # Cap tm so the tm x f f32 hidden intermediate stays <= ~8 MiB (fits v7x's
    # 64 MiB physical VMEM with double-buffered I/O blocks and weights).
    cap = max(256, (8 * 1024 * 1024) // (4 * max(f, 1)))
    cap = max(8, (cap // 8) * 8)
    tm = min(1024, cap)
    return n if n <= tm else tm


def _gelu_tanh(x):
    # TODO(synk): PyTorch nn.GELU() defaults to exact erf GELU; tanh approximation
    # used here (no erf lowering required, EUP-friendly on TPU).
    c = math.sqrt(2.0 / math.pi)
    return 0.5 * x * (1.0 + jnp.tanh(c * (x + 0.044715 * x * x * x)))


def _layernorm_f32(x, g, b, eps=1e-5):
    mean = jnp.mean(x, axis=-1, keepdims=True)
    cen = x - mean
    var = jnp.mean(cen * cen, axis=-1, keepdims=True)
    return cen * jax.lax.rsqrt(var + eps) * g + b


# -----------------------------------------------------------------------------
# Kernel 1: fused pre-LayerNorm + packed Q/K projection + V projection
#   q = (LN(x) + pos) @ (wq / sqrt(hd)) ; k = (LN(x) + pos) @ wk ; v = LN(x) @ wv
#   (bf16 activations in, LayerNorm math in f32, bf16 MXU inputs, f32 accumulate)
# -----------------------------------------------------------------------------
def _prenorm_qkv_kernel(x_ref, pos_ref, g_ref, b_ref, wqk_ref, wv_ref,
                        q_ref, k_ref, v_ref, *, d_model):
    x = x_ref[...].astype(jnp.float32)
    xn = _layernorm_f32(x, g_ref[...], b_ref[...])
    qk_in = (xn + pos_ref[...].astype(jnp.float32)).astype(jnp.bfloat16)
    v_in = xn.astype(jnp.bfloat16)
    qk = jnp.dot(qk_in, wqk_ref[...], preferred_element_type=jnp.float32)
    q_ref[...] = qk[:, :d_model].astype(q_ref.dtype)
    k_ref[...] = qk[:, d_model:].astype(k_ref.dtype)
    v_ref[...] = jnp.dot(v_in, wv_ref[...],
                         preferred_element_type=jnp.float32).astype(v_ref.dtype)


def prenorm_qkv_projection(x, pos, gamma, beta, wqk, wv):
    n, d = x.shape
    tm = _row_tile(n)
    row = lambda i: (i, 0)
    const = lambda i: (0, 0)
    return pl.pallas_call(
        partial(_prenorm_qkv_kernel, d_model=d),
        out_shape=(
            jax.ShapeDtypeStruct((n, d), jnp.bfloat16),
            jax.ShapeDtypeStruct((n, d), jnp.bfloat16),
            jax.ShapeDtypeStruct((n, d), jnp.bfloat16),
        ),
        grid=(pl.cdiv(n, tm),),
        in_specs=[
            pl.BlockSpec((tm, d), row),
            pl.BlockSpec((tm, d), row),
            pl.BlockSpec((1, d), const),
            pl.BlockSpec((1, d), const),
            pl.BlockSpec((d, 2 * d), const),
            pl.BlockSpec((d, d), const),
        ],
        out_specs=(
            pl.BlockSpec((tm, d), row),
            pl.BlockSpec((tm, d), row),
            pl.BlockSpec((tm, d), row),
        ),
        compiler_params=pltpu.CompilerParams(
            dimension_semantics=("parallel",),
            vmem_limit_bytes=_VMEM_LIMIT),
    )(x, pos, gamma, beta, wqk, wv)


# -----------------------------------------------------------------------------
# Kernel 2: head-batched flash attention with fused output projection + residual.
#   grid = (B, q_tiles, kv_tiles); Q/K/V are head-major (B, H, S, hd).
#   Online softmax state (running max / sum / acc) lives in VMEM scratch bounded
#   by the q tile.  1/sqrt(hd) is folded into wq.  Epilogue (last kv tile) applies
#   the per-head output projection slices of wo and adds the residual.
# -----------------------------------------------------------------------------
def _flash_mha_kernel(q_ref, k_ref, v_ref, bias_ref, res_ref, wo_ref, o_ref,
                      m_sc, l_sc, acc_sc, *, n_heads, kv_tile, seq_len):
    ki = pl.program_id(2)

    @pl.when(ki == 0)
    def _():
        m_sc[...] = jnp.full_like(m_sc, _NEG_INF_INIT)
        l_sc[...] = jnp.zeros_like(l_sc)
        acc_sc[...] = jnp.zeros_like(acc_sc)

    q = q_ref[0]          # (H, tq, hd) bf16, scale already folded into wq
    kt = k_ref[0]         # (H, tk, hd) bf16
    vt = v_ref[0]         # (H, tk, hd) bf16

    # Head-batched QK^T on the MXU: (H, tq, tk) f32.
    s = jax.lax.dot_general(q, kt, (((2,), (2,)), ((0,), (0,))),
                            preferred_element_type=jnp.float32)

    # Key-padding bias + tail-tile guard, computed ONCE per kv tile for all heads.
    # The where (not an add) also protects against garbage in the out-of-range tail
    # rows of a partial K/V block.
    col = ki * kv_tile + jax.lax.broadcasted_iota(jnp.int32, (1, 1, kv_tile), 2)
    s = jnp.where(col < seq_len, s + bias_ref[...], _MASK_VALUE)

    m_prev = m_sc[...]                                         # (H, tq, 1)
    m_new = jnp.maximum(m_prev, jnp.max(s, axis=-1, keepdims=True))
    alpha = jnp.exp(m_prev - m_new)
    p = jnp.exp(s - m_new)                                     # (H, tq, tk)
    l_sc[...] = alpha * l_sc[...] + jnp.sum(p, axis=-1, keepdims=True)
    acc_sc[...] = alpha * acc_sc[...] + jax.lax.dot_general(
        p.astype(vt.dtype), vt, (((2,), (1,)), ((0,), (0,))),
        preferred_element_type=jnp.float32)
    m_sc[...] = m_new

    @pl.when(ki == pl.num_programs(2) - 1)
    def _():
        # Exact normalization (per review: no approx reciprocal on the denominator).
        heads = (acc_sc[...] / l_sc[...]).astype(jnp.bfloat16)   # (H, tq, hd)
        y = res_ref[0].astype(jnp.float32)                       # (tq, D) residual
        for h in range(n_heads):                                 # per-head wo slabs:
            y = y + jnp.dot(heads[h], wo_ref[h],                 # (tq,hd)@(hd,D)
                            preferred_element_type=jnp.float32)
        o_ref[0] = y.astype(o_ref.dtype)


def flash_self_attention(q, k, v, key_bias, residual, wo_heads,
                         *, q_tile=512, kv_tile=512):
    """q,k,v: (B, H, S, hd) bf16 head-major; key_bias: (B, 1, S) f32 additive mask;
    residual: (B, S, D) bf16; wo_heads: (H, hd, D) bf16.  Returns (B, S, D) f32 of
    residual + concat_heads(softmax(qk^T)v) @ wo."""
    B, H, S, hd = q.shape
    D = H * hd
    tq = S if S <= q_tile else q_tile
    tk = S if S <= kv_tile else kv_tile
    grid = (B, pl.cdiv(S, tq), pl.cdiv(S, tk))
    return pl.pallas_call(
        partial(_flash_mha_kernel, n_heads=H, kv_tile=tk, seq_len=S),
        out_shape=jax.ShapeDtypeStruct((B, S, D), jnp.float32),
        grid=grid,
        in_specs=[
            pl.BlockSpec((1, H, tq, hd), lambda b, qi, ki: (b, 0, qi, 0)),
            pl.BlockSpec((1, H, tk, hd), lambda b, qi, ki: (b, 0, ki, 0)),
            pl.BlockSpec((1, H, tk, hd), lambda b, qi, ki: (b, 0, ki, 0)),
            pl.BlockSpec((1, 1, tk),     lambda b, qi, ki: (b, 0, ki)),
            pl.BlockSpec((1, tq, D),     lambda b, qi, ki: (b, qi, 0)),
            pl.BlockSpec((H, hd, D),     lambda b, qi, ki: (0, 0, 0)),
        ],
        out_specs=pl.BlockSpec((1, tq, D), lambda b, qi, ki: (b, qi, 0)),
        scratch_shapes=[
            pltpu.VMEM((H, tq, 1), jnp.float32),    # running max
            pltpu.VMEM((H, tq, 1), jnp.float32),    # running sum
            pltpu.VMEM((H, tq, hd), jnp.float32),   # output accumulator
        ],
        compiler_params=pltpu.CompilerParams(
            dimension_semantics=("parallel", "parallel", "arbitrary"),
            vmem_limit_bytes=_VMEM_LIMIT),
    )(q, k, v, key_bias, residual, wo_heads)


# -----------------------------------------------------------------------------
# Kernel 3: fused FFN block:  out = x + (gelu(LN(x) @ w1 + b1) @ w2 + b2)
#   (hidden activation stays in VMEM; residual trunk kept f32 for precision)
# -----------------------------------------------------------------------------
def _ffn_kernel(x_ref, g_ref, b_ref, w1_ref, b1_ref, w2_ref, b2_ref, o_ref):
    x = x_ref[...].astype(jnp.float32)
    xn = _layernorm_f32(x, g_ref[...], b_ref[...])
    h = jnp.dot(xn.astype(jnp.bfloat16), w1_ref[...],
                preferred_element_type=jnp.float32) + b1_ref[...]
    h = _gelu_tanh(h)
    y = jnp.dot(h.astype(jnp.bfloat16), w2_ref[...],
                preferred_element_type=jnp.float32) + b2_ref[...]
    o_ref[...] = (x + y).astype(o_ref.dtype)


def fused_ffn(x, gamma, beta, w1, b1, w2, b2):
    n, d = x.shape
    f = w1.shape[1]
    tm = _ffn_row_tile(n, f)
    row = lambda i: (i, 0)
    const = lambda i: (0, 0)
    return pl.pallas_call(
        _ffn_kernel,
        out_shape=jax.ShapeDtypeStruct((n, d), x.dtype),
        grid=(pl.cdiv(n, tm),),
        in_specs=[
            pl.BlockSpec((tm, d), row),
            pl.BlockSpec((1, d), const),
            pl.BlockSpec((1, d), const),
            pl.BlockSpec((d, f), const),
            pl.BlockSpec((1, f), const),
            pl.BlockSpec((f, d), const),
            pl.BlockSpec((1, d), const),
        ],
        out_specs=pl.BlockSpec((tm, d), row),
        compiler_params=pltpu.CompilerParams(
            dimension_semantics=("parallel",),
            vmem_limit_bytes=_VMEM_LIMIT),
    )(x, gamma, beta, w1, b1, w2, b2)


# -----------------------------------------------------------------------------
# Device-side (jit-safe) batching helper
# -----------------------------------------------------------------------------
def batch_pad(x, batch_offsets, max_len, pad_value=0.0):
    """Pad flat per-token tensor (N, ...) into (B, max_len, ...); returns pad_mask (True=pad)."""
    n_total = x.shape[0]
    offs = batch_offsets.astype(jnp.int32)
    bounds = jnp.concatenate([offs, jnp.asarray([n_total], jnp.int32)])
    lengths = bounds[1:] - bounds[:-1]                          # (B,)
    pos = jnp.arange(max_len, dtype=jnp.int32)[None, :]         # (1, L)
    valid = pos < lengths[:, None]                              # (B, L)
    gidx = jnp.minimum(offs[:, None] + pos, n_total - 1)
    vals = x[gidx]
    mask = valid if x.ndim == 1 else valid.reshape(valid.shape + (1,) * (x.ndim - 1))
    vals = jnp.where(mask, vals, pad_value)
    return vals, ~valid


def _to_head_major(x, B, S, H, hd):
    # (B*S, H*hd) -> (B, H, S, hd); cheap wrapper reshape/transpose so the attention
    # kernel never does non-lane-aligned head slicing.
    return x.reshape(B, S, H, hd).transpose(0, 2, 1, 3)


def init_params(key, d_model, n_heads, dim_feedforward):
    ks = jax.random.split(key, 8)
    s = 0.05
    return {
        "wq": jax.random.normal(ks[0], (d_model, d_model), jnp.float32) * s,
        "wk": jax.random.normal(ks[1], (d_model, d_model), jnp.float32) * s,
        "wv": jax.random.normal(ks[2], (d_model, d_model), jnp.float32) * s,
        "wo": jax.random.normal(ks[3], (d_model, d_model), jnp.float32) * s,
        "ln1_g": jnp.ones((d_model,), jnp.float32),
        "ln1_b": jnp.zeros((d_model,), jnp.float32),
        "ffn_w1": jax.random.normal(ks[4], (d_model, dim_feedforward), jnp.float32) * s,
        "ffn_b1": jax.random.normal(ks[5], (dim_feedforward,), jnp.float32) * s,
        "ffn_w2": jax.random.normal(ks[6], (dim_feedforward, d_model), jnp.float32) * s,
        "ffn_b2": jax.random.normal(ks[7], (d_model,), jnp.float32) * s,
        "ln2_g": jnp.ones((d_model,), jnp.float32),
        "ln2_b": jnp.zeros((d_model,), jnp.float32),
    }


# -----------------------------------------------------------------------------
# Forward pass (jittable; n_heads / topk_sa / max_len are static Python ints)
# -----------------------------------------------------------------------------
def transformer_encoder_layer_forward(
    params,
    queries,                        # (N, d_model) f32 residual trunk
    query_pos_encoding,             # (N, d_model)
    query_bijl_indices,             # (N, 4) int32 -- unused without RoPE / sparse attn
    query_normalized_xy_positions,  # (N, 2)      -- used only by msdeform attn (disabled)
    batch_offsets,                  # (B,) int32
    stacked_feature_maps,           # used only by sparse attn blocks (disabled)
    spatial_shapes,                 # (L, 2) int32 -- used only by sparse attn blocks
    token_predicted_salience,       # (N,)
    token_electron_probs,           # (N,)
    *,
    n_heads,
    topk_sa=1000,
    max_len=None,
):
    n_total, d_model = queries.shape
    head_dim = d_model // n_heads
    scale = 1.0 / math.sqrt(head_dim)

    # ---- token scoring + per-batch top-k self-attention candidate selection ----
    token_scores = token_electron_probs * jax.nn.sigmoid(token_predicted_salience)
    scores_b, pad_mask = batch_pad(token_scores, batch_offsets, max_len,
                                   pad_value=-jnp.inf)                  # (B, L)
    k = min(topk_sa, max_len)
    _, indices = jax.lax.top_k(scores_b, k)                             # (B, k)
    sel_pad = jnp.take_along_axis(pad_mask, indices, axis=1)            # (B, k) True = pad
    flat_idx = batch_offsets[:, None].astype(jnp.int32) + indices.astype(jnp.int32)
    gather_idx = jnp.minimum(flat_idx, n_total - 1)
    # TODO(synk): this XLA gather could be folded into the projection kernel via
    # PrefetchScalarGridSpec + a data-dependent index_map; kept in XLA to avoid a
    # one-row-per-grid-step gather pattern.
    sel_q = queries[gather_idx]                                         # (B, k, D) f32
    sel_pos = query_pos_encoding[gather_idx]                            # (B, k, D)
    B = sel_q.shape[0]

    sel_q_bf = sel_q.astype(jnp.bfloat16)        # bf16 activations into the kernels
    sel_pos_bf = sel_pos.astype(jnp.bfloat16)

    # ---- SelfAttentionBlock: fused pre-LN + packed QK / V projections ----
    #      (1/sqrt(hd) folded into wq; bf16 MXU inputs, f32 accumulation)
    wqk = jnp.concatenate([params["wq"] * scale, params["wk"]],
                          axis=1).astype(jnp.bfloat16)
    wv = params["wv"].astype(jnp.bfloat16)
    q, kk, v = prenorm_qkv_projection(
        sel_q_bf.reshape(-1, d_model), sel_pos_bf.reshape(-1, d_model),
        params["ln1_g"].reshape(1, -1), params["ln1_b"].reshape(1, -1), wqk, wv)

    q = _to_head_major(q, B, k, n_heads, head_dim)                      # (B, H, k, hd)
    kk = _to_head_major(kk, B, k, n_heads, head_dim)
    v = _to_head_major(v, B, k, n_heads, head_dim)

    key_bias = jnp.where(sel_pad, _MASK_VALUE, 0.0).astype(jnp.float32)[:, None, :]
    wo_heads = params["wo"].reshape(n_heads, head_dim, d_model).astype(jnp.bfloat16)

    # flash attention + fused output projection + residual add (dropout = identity)
    sa_out = flash_self_attention(q, kk, v, key_bias, sel_q_bf, wo_heads)  # (B,k,D) f32

    # ---- scatter self-attn outputs back into the flat query tensor ----
    scatter_idx = jnp.where(sel_pad, n_total, flat_idx).reshape(-1)     # pads -> OOB
    queries = queries.at[scatter_idx].set(sa_out.reshape(-1, d_model), mode="drop")

    # TODO(synk): SparseDeformableAttentionBlock and SparseNeighborhoodAttentionBlock
    # depend on emsim sparse-feature-map machinery not defined in this module; they
    # are disabled here (equivalent to use_msdeform_attn=False, use_neighborhood_attn=False).

    # ---- FFNBlock: fused pre-LN -> linear -> gelu -> linear -> residual ----
    queries = fused_ffn(
        queries,
        params["ln2_g"].reshape(1, -1), params["ln2_b"].reshape(1, -1),
        params["ffn_w1"].astype(jnp.bfloat16), params["ffn_b1"].reshape(1, -1),
        params["ffn_w2"].astype(jnp.bfloat16), params["ffn_b2"].reshape(1, -1))
    return queries


# -----------------------------------------------------------------------------
# Demo
# -----------------------------------------------------------------------------
if __name__ == "__main__":
    d_model, n_heads, dim_feedforward = 128, 4, 256
    n_levels = 4
    lengths = [6, 8]  # tokens per batch element (unequal -> exercises padding path)
    n_total = int(sum(lengths))
    max_len = int(max(lengths))
    batch_offsets = jnp.asarray(
        np.concatenate([[0], np.cumsum(lengths)[:-1]]).astype(np.int32)
    )

    key = jax.random.PRNGKey(0)
    ks = jax.random.split(key, 10)

    queries = jax.random.normal(ks[0], (n_total, d_model), jnp.float32)
    query_pos_encoding = jax.random.normal(ks[1], (n_total, d_model), jnp.float32)
    b_idx = jnp.concatenate(
        [jnp.full((l,), b, jnp.int32) for b, l in enumerate(lengths)]
    )
    ii = jax.random.randint(ks[2], (n_total,), 0, 8, jnp.int32)
    jj = jax.random.randint(ks[3], (n_total,), 0, 8, jnp.int32)
    lvl = jax.random.randint(ks[4], (n_total,), 0, n_levels, jnp.int32)
    query_bijl_indices = jnp.stack([b_idx, ii, jj, lvl], axis=-1)
    query_normalized_xy_positions = jax.random.uniform(ks[5], (n_total, 2), jnp.float32)
    stacked_feature_maps = jax.random.normal(
        ks[6], (len(lengths), n_levels, 8, 8, d_model), jnp.float32
    )
    spatial_shapes = jnp.asarray([[8, 8], [4, 4], [2, 2], [1, 1]], jnp.int32)
    token_predicted_salience = jax.random.normal(ks[7], (n_total,), jnp.float32)
    token_electron_probs = jax.nn.sigmoid(
        jax.random.normal(ks[8], (n_total,), jnp.float32)
    )

    params = init_params(ks[9], d_model, n_heads, dim_feedforward)

    fwd = jax.jit(partial(transformer_encoder_layer_forward,
                          n_heads=n_heads, topk_sa=1000, max_len=max_len))
    out = fwd(
        params,
        queries,
        query_pos_encoding,
        query_bijl_indices,
        query_normalized_xy_positions,
        batch_offsets,
        stacked_feature_maps,
        spatial_shapes,
        token_predicted_salience,
        token_electron_probs,
    )
    out = jax.block_until_ready(out)
    assert out.shape == (n_total, d_model)
    assert bool(jnp.all(jnp.isfinite(out)))
    print("KERNEL_OK")
</pallas_src>

<mosaic_0001>
module attributes {stable_mosaic.version = 11 : i64} {
  func.func @_prenorm_qkv_kernel(%arg0: i32, %arg1: memref<16x128xbf16, #tpu.memory_space<vmem>>, %arg2: memref<16x128xbf16, #tpu.memory_space<vmem>>, %arg3: memref<1x128xf32, #tpu.memory_space<vmem>>, %arg4: memref<1x128xf32, #tpu.memory_space<vmem>>, %arg5: memref<128x256xbf16, #tpu.memory_space<vmem>>, %arg6: memref<128x128xbf16, #tpu.memory_space<vmem>>, %arg7: memref<16x128xbf16, #tpu.memory_space<vmem>>, %arg8: memref<16x128xbf16, #tpu.memory_space<vmem>>, %arg9: memref<16x128xbf16, #tpu.memory_space<vmem>>) attributes {dimension_semantics = [#tpu.dimension_semantics<parallel>], iteration_bounds = array<i64: 1>, scalar_prefetch = 0 : i64, scratch_operands = 0 : i64, tpu.core_type = #tpu.core_type<tc>, window_params = [{transform_indices = @transform_0, window_bounds = array<i64: 16, 128>}, {transform_indices = @transform_1, window_bounds = array<i64: 16, 128>}, {pipeline_mode = #tpu.pipeline_mode<synchronous>, transform_indices = @transform_2, window_bounds = array<i64: 1, 128>}, {pipeline_mode = #tpu.pipeline_mode<synchronous>, transform_indices = @transform_3, window_bounds = array<i64: 1, 128>}, {pipeline_mode = #tpu.pipeline_mode<synchronous>, transform_indices = @transform_4, window_bounds = array<i64: 128, 256>}, {pipeline_mode = #tpu.pipeline_mode<synchronous>, transform_indices = @transform_5, window_bounds = array<i64: 128, 128>}, {transform_indices = @transform_6, window_bounds = array<i64: 16, 128>}, {transform_indices = @transform_7, window_bounds = array<i64: 16, 128>}, {transform_indices = @transform_8, window_bounds = array<i64: 16, 128>}]} {
    %c0 = arith.constant 0 : index
    %c0_0 = arith.constant 0 : index
    %0 = vector.load %arg1[%c0, %c0_0] : memref<16x128xbf16, #tpu.memory_space<vmem>>, vector<16x128xbf16>
    %1 = arith.extf %0 : vector<16x128xbf16> to vector<16x128xf32>
    %c0_1 = arith.constant 0 : index
    %c0_2 = arith.constant 0 : index
    %2 = vector.load %arg3[%c0_1, %c0_2] : memref<1x128xf32, #tpu.memory_space<vmem>>, vector<1x128xf32>
    %c0_3 = arith.constant 0 : index
    %c0_4 = arith.constant 0 : index
    %3 = vector.load %arg4[%c0_3, %c0_4] : memref<1x128xf32, #tpu.memory_space<vmem>>, vector<1x128xf32>
    %cst = arith.constant dense<0.000000e+00> : vector<16xf32>
    %4 = vector.multi_reduction <add>, %1, %cst [1] : vector<16x128xf32> to vector<16xf32>
    %5 = vector.shape_cast %4 : vector<16xf32> to vector<16x1xf32>
    %cst_5 = arith.constant 1.280000e+02 : f32
    %6 = vector.broadcast %cst_5 : f32 to vector<16x1xf32>
    %7 = arith.divf %5, %6 : vector<16x1xf32>
    %8 = vector.broadcast %7 : vector<16x1xf32> to vector<16x128xf32>
    %9 = arith.subf %1, %8 : vector<16x128xf32>
    %10 = arith.mulf %9, %9 : vector<16x128xf32>
    %cst_6 = arith.constant dense<0.000000e+00> : vector<16xf32>
    %11 = vector.multi_reduction <add>, %10, %cst_6 [1] : vector<16x128xf32> to vector<16xf32>
    %12 = vector.shape_cast %11 : vector<16xf32> to vector<16x1xf32>
    %cst_7 = arith.constant 1.280000e+02 : f32
    %13 = vector.broadcast %cst_7 : f32 to vector<16x1xf32>
    %14 = arith.divf %12, %13 : vector<16x1xf32>
    %cst_8 = arith.constant 9.99999974E-6 : f32
    %15 = vector.broadcast %cst_8 : f32 to vector<16x1xf32>
    %16 = arith.addf %14, %15 : vector<16x1xf32>
    %17 = math.rsqrt %16 : vector<16x1xf32>
    %18 = vector.broadcast %17 : vector<16x1xf32> to vector<16x128xf32>
    %19 = arith.mulf %9, %18 : vector<16x128xf32>
    %20 = vector.broadcast %2 : vector<1x128xf32> to vector<16x128xf32>
    %21 = arith.mulf %19, %20 : vector<16x128xf32>
    %22 = vector.broadcast %3 : vector<1x128xf32> to vector<16x128xf32>
    %23 = arith.addf %21, %22 : vector<16x128xf32>
    %c0_9 = arith.constant 0 : index
    %c0_10 = arith.constant 0 : index
    %24 = vector.load %arg2[%c0_9, %c0_10] : memref<16x128xbf16, #tpu.memory_space<vmem>>, vector<16x128xbf16>
    %25 = arith.extf %24 : vector<16x128xbf16> to vector<16x128xf32>
    %26 = arith.addf %23, %25 : vector<16x128xf32>
    %27 = arith.truncf %26 : vector<16x128xf32> to vector<16x128xbf16>
    %28 = arith.truncf %23 : vector<16x128xf32> to vector<16x128xbf16>
    %c0_11 = arith.constant 0 : index
    %c0_12 = arith.constant 0 : index
    %29 = vector.load %arg5[%c0_11, %c0_12] : memref<128x256xbf16, #tpu.memory_space<vmem>>, vector<128x256xbf16>
    %cst_13 = arith.constant dense<0.000000e+00> : vector<16x256xf32>
    %30 = tpu.matmul %27, %29, %cst_13 {dimension_numbers = #tpu.dot_dimension_numbers<[1], [0], [0], [1], [0, 0, 1, 1], [], []>} : vector<16x128xbf16>, vector<128x256xbf16>, vector<16x256xf32> -> vector<16x256xf32>
    %31 = vector.extract_strided_slice %30 {offsets = [0, 0], sizes = [16, 128], strides = [1, 1]} : vector<16x256xf32> to vector<16x128xf32>
    %32 = arith.truncf %31 : vector<16x128xf32> to vector<16x128xbf16>
    %c0_14 = arith.constant 0 : index
    %c0_15 = arith.constant 0 : index
    %33 = vector.load %arg7[%c0_14, %c0_15] : memref<16x128xbf16, #tpu.memory_space<vmem>>, vector<16x128xbf16>
    tpu.vector_store %arg7[%c0_14, %c0_15], %32 {strides = array<i32>} : memref<16x128xbf16, #tpu.memory_space<vmem>>, vector<16x128xbf16>,
    %34 = vector.extract_strided_slice %30 {offsets = [0, 128], sizes = [16, 128], strides = [1, 1]} : vector<16x256xf32> to vector<16x128xf32>
    %35 = arith.truncf %34 : vector<16x128xf32> to vector<16x128xbf16>
    %c0_16 = arith.constant 0 : index
    %c0_17 = arith.constant 0 : index
    %36 = vector.load %arg8[%c0_16, %c0_17] : memref<16x128xbf16, #tpu.memory_space<vmem>>, vector<16x128xbf16>
    tpu.vector_store %arg8[%c0_16, %c0_17], %35 {strides = array<i32>} : memref<16x128xbf16, #tpu.memory_space<vmem>>, vector<16x128xbf16>,
    %c0_18 = arith.constant 0 : index
    %c0_19 = arith.constant 0 : index
    %37 = vector.load %arg6[%c0_18, %c0_19] : memref<128x128xbf16, #tpu.memory_space<vmem>>, vector<128x128xbf16>
    %cst_20 = arith.constant dense<0.000000e+00> : vector<16x128xf32>
    %38 = tpu.matmul %28, %37, %cst_20 {dimension_numbers = #tpu.dot_dimension_numbers<[1], [0], [0], [1], [0, 0, 1, 1], [], []>} : vector<16x128xbf16>, vector<128x128xbf16>, vector<16x128xf32> -> vector<16x128xf32>
    %39 = arith.truncf %38 : vector<16x128xf32> to vector<16x128xbf16>
    %c0_21 = arith.constant 0 : index
    %c0_22 = arith.constant 0 : index
    %40 = vector.load %arg9[%c0_21, %c0_22] : memref<16x128xbf16, #tpu.memory_space<vmem>>, vector<16x128xbf16>
    tpu.vector_store %arg9[%c0_21, %c0_22], %39 {strides = array<i32>} : memref<16x128xbf16, #tpu.memory_space<vmem>>, vector<16x128xbf16>,
    return
  }
  func.func @transform_0(%arg0: i32) -> (i32, i32) {
    %c0_i32 = arith.constant 0 : i32
    %c0_i32_0 = arith.constant 0 : i32
    return %arg0, %c0_i32 : i32, i32
  }
  func.func @transform_1(%arg0: i32) -> (i32, i32) {
    %c0_i32 = arith.constant 0 : i32
    %c0_i32_0 = arith.constant 0 : i32
    return %arg0, %c0_i32 : i32, i32
  }
  func.func @transform_2(%arg0: i32) -> (i32, i32) {
    %c0_i32 = arith.constant 0 : i32
    %c0_i32_0 = arith.constant 0 : i32
    %c0_i32_1 = arith.constant 0 : i32
    return %c0_i32, %c0_i32_0 : i32, i32
  }
  func.func @transform_3(%arg0: i32) -> (i32, i32) {
    %c0_i32 = arith.constant 0 : i32
    %c0_i32_0 = arith.constant 0 : i32
    %c0_i32_1 = arith.constant 0 : i32
    return %c0_i32, %c0_i32_0 : i32, i32
  }
  func.func @transform_4(%arg0: i32) -> (i32, i32) {
    %c0_i32 = arith.constant 0 : i32
    %c0_i32_0 = arith.constant 0 : i32
    %c0_i32_1 = arith.constant 0 : i32
    return %c0_i32, %c0_i32_0 : i32, i32
  }
  func.func @transform_5(%arg0: i32) -> (i32, i32) {
    %c0_i32 = arith.constant 0 : i32
    %c0_i32_0 = arith.constant 0 : i32
    %c0_i32_1 = arith.constant 0 : i32
    return %c0_i32, %c0_i32_0 : i32, i32
  }
  func.func @transform_6(%arg0: i32) -> (i32, i32) {
    %c0_i32 = arith.constant 0 : i32
    %c0_i32_0 = arith.constant 0 : i32
    return %arg0, %c0_i32 : i32, i32
  }
  func.func @transform_7(%arg0: i32) -> (i32, i32) {
    %c0_i32 = arith.constant 0 : i32
    %c0_i32_0 = arith.constant 0 : i32
    return %arg0, %c0_i32 : i32, i32
  }
  func.func @transform_8(%arg0: i32) -> (i32, i32) {
    %c0_i32 = arith.constant 0 : i32
    %c0_i32_0 = arith.constant 0 : i32
    return %arg0, %c0_i32 : i32, i32
  }
}

module attributes {stable_mosaic.version = 11 : i64} {
  func.func @_flash_mha_kernel(%arg0: i32, %arg1: i32, %arg2: i32, %arg3: memref<1x4x8x32xbf16, #tpu.memory_space<vmem>>, %arg4: memref<1x4x8x32xbf16, #tpu.memory_space<vmem>>, %arg5: memref<1x4x8x32xbf16, #tpu.memory_space<vmem>>, %arg6: memref<1x1x8xf32, #tpu.memory_space<vmem>>, %arg7: memref<1x8x128xbf16, #tpu.memory_space<vmem>>, %arg8: memref<4x32x128xbf16, #tpu.memory_space<vmem>>, %arg9: memref<1x8x128xf32, #tpu.memory_space<vmem>>, %arg10: memref<4x8x1xf32, #tpu.memory_space<vmem>>, %arg11: memref<4x8x1xf32, #tpu.memory_space<vmem>>, %arg12: memref<4x8x32xf32, #tpu.memory_space<vmem>>) attributes {dimension_semantics = [#tpu.dimension_semantics<parallel>, #tpu.dimension_semantics<parallel>, #tpu.dimension_semantics<arbitrary>], iteration_bounds = array<i64: 2, 1, 1>, scalar_prefetch = 0 : i64, scratch_operands = 3 : i64, tpu.core_type = #tpu.core_type<tc>, window_params = [{transform_indices = @transform_0, window_bounds = array<i64: 1, 4, 8, 32>}, {transform_indices = @transform_1, window_bounds = array<i64: 1, 4, 8, 32>}, {transform_indices = @transform_2, window_bounds = array<i64: 1, 4, 8, 32>}, {transform_indices = @transform_3, window_bounds = array<i64: 1, 1, 8>}, {transform_indices = @transform_4, window_bounds = array<i64: 1, 8, 128>}, {pipeline_mode = #tpu.pipeline_mode<synchronous>, transform_indices = @transform_5, window_bounds = array<i64: 4, 32, 128>}, {transform_indices = @transform_6, window_bounds = array<i64: 1, 8, 128>}]} {
    %c0_i32 = arith.constant 0 : i32
    %0 = arith.cmpi eq, %arg2, %c0_i32 : i32
    %1 = arith.extui %0 : i1 to i32
    %c0_i32_0 = arith.constant 0 : i32
    %2 = arith.cmpi ne, %1, %c0_i32_0 : i32
    scf.if %2 {
      %cst_40 = arith.constant -1.000000e+30 : f32
      %49 = vector.broadcast %cst_40 : f32 to vector<4x8x1xf32>
      %c0_41 = arith.constant 0 : index
      %c0_42 = arith.constant 0 : index
      %c0_43 = arith.constant 0 : index
      %50 = vector.load %arg10[%c0_41, %c0_42, %c0_43] : memref<4x8x1xf32, #tpu.memory_space<vmem>>, vector<4x8x1xf32>
      tpu.vector_store %arg10[%c0_41, %c0_42, %c0_43], %49 {strides = array<i32>} : memref<4x8x1xf32, #tpu.memory_space<vmem>>, vector<4x8x1xf32>,
      %cst_44 = arith.constant 0.000000e+00 : f32
      %51 = vector.broadcast %cst_44 : f32 to vector<4x8x1xf32>
      %c0_45 = arith.constant 0 : index
      %c0_46 = arith.constant 0 : index
      %c0_47 = arith.constant 0 : index
      %52 = vector.load %arg11[%c0_45, %c0_46, %c0_47] : memref<4x8x1xf32, #tpu.memory_space<vmem>>, vector<4x8x1xf32>
      tpu.vector_store %arg11[%c0_45, %c0_46, %c0_47], %51 {strides = array<i32>} : memref<4x8x1xf32, #tpu.memory_space<vmem>>, vector<4x8x1xf32>,
      %cst_48 = arith.constant 0.000000e+00 : f32
      %53 = vector.broadcast %cst_48 : f32 to vector<4x8x32xf32>
      %c0_49 = arith.constant 0 : index
      %c0_50 = arith.constant 0 : index
      %c0_51 = arith.constant 0 : index
      %54 = vector.load %arg12[%c0_49, %c0_50, %c0_51] : memref<4x8x32xf32, #tpu.memory_space<vmem>>, vector<4x8x32xf32>
      tpu.vector_store %arg12[%c0_49, %c0_50, %c0_51], %53 {strides = array<i32>} : memref<4x8x32xf32, #tpu.memory_space<vmem>>, vector<4x8x32xf32>,
    } else {
    }
    %c0 = arith.constant 0 : index
    %c0_1 = arith.constant 0 : index
    %c0_2 = arith.constant 0 : index
    %c0_3 = arith.constant 0 : index
    %3 = vector.load %arg3[%c0, %c0_1, %c0_2, %c0_3] : memref<1x4x8x32xbf16, #tpu.memory_space<vmem>>, vector<1x4x8x32xbf16>
    %4 = vector.shape_cast %3 : vector<1x4x8x32xbf16> to vector<4x8x32xbf16>
    %c0_4 = arith.constant 0 : index
    %c0_5 = arith.constant 0 : index
    %c0_6 = arith.constant 0 : index
    %c0_7 = arith.constant 0 : index
    %5 = vector.load %arg4[%c0_4, %c0_5, %c0_6, %c0_7] : memref<1x4x8x32xbf16, #tpu.memory_space<vmem>>, vector<1x4x8x32xbf16>
    %6 = vector.shape_cast %5 : vector<1x4x8x32xbf16> to vector<4x8x32xbf16>
    %c0_8 = arith.constant 0 : index
    %c0_9 = arith.constant 0 : index
    %c0_10 = arith.constant 0 : index
    %c0_11 = arith.constant 0 : index
    %7 = vector.load %arg5[%c0_8, %c0_9, %c0_10, %c0_11] : memref<1x4x8x32xbf16, #tpu.memory_space<vmem>>, vector<1x4x8x32xbf16>
    %8 = vector.shape_cast %7 : vector<1x4x8x32xbf16> to vector<4x8x32xbf16>
    %cst = arith.constant dense<0.000000e+00> : vector<4x8x8xf32>
    %9 = tpu.matmul %4, %6, %cst {dimension_numbers = #tpu.dot_dimension_numbers<[2], [2], [1], [1], [0, 0, 0, 1, 1, 1], [0], [0]>} : vector<4x8x32xbf16>, vector<4x8x32xbf16>, vector<4x8x8xf32> -> vector<4x8x8xf32>
    %c8_i32 = arith.constant 8 : i32
    %10 = arith.muli %arg2, %c8_i32 : i32
    %11 = tpu.iota {dimensions = array<i32: 2>} : vector<1x1x8xi32>
    %12 = vector.broadcast %10 : i32 to vector<1x1x8xi32>
    %13 = arith.addi %12, %11 : vector<1x1x8xi32>
    %c8_i32_12 = arith.constant 8 : i32
    %14 = vector.broadcast %c8_i32_12 : i32 to vector<1x1x8xi32>
    %15 = arith.cmpi slt, %13, %14 : vector<1x1x8xi32>
    %c0_13 = arith.constant 0 : index
    %c0_14 = arith.constant 0 : index
    %c0_15 = arith.constant 0 : index
    %16 = vector.load %arg6[%c0_13, %c0_14, %c0_15] : memref<1x1x8xf32, #tpu.memory_space<vmem>>, vector<1x1x8xf32>
    %17 = vector.broadcast %16 : vector<1x1x8xf32> to vector<4x8x8xf32>
    %18 = arith.addf %9, %17 : vector<4x8x8xf32>
    %cst_16 = arith.constant -2.000000e+30 : f32
    %19 = vector.shape_cast %15 : vector<1x1x8xi1> to vector<1x1x8xi1>
    %20 = vector.broadcast %19 : vector<1x1x8xi1> to vector<4x8x8xi1>
    %21 = vector.broadcast %cst_16 : f32 to vector<4x8x8xf32>
    %22 = arith.select %20, %18, %21 : vector<4x8x8xi1>, vector<4x8x8xf32>
    %c0_17 = arith.constant 0 : index
    %c0_18 = arith.constant 0 : index
    %c0_19 = arith.constant 0 : index
    %23 = vector.load %arg10[%c0_17, %c0_18, %c0_19] : memref<4x8x1xf32, #tpu.memory_space<vmem>>, vector<4x8x1xf32>
    %cst_20 = arith.constant dense<0xFF800000> : vector<4x8xf32>
    %24 = vector.multi_reduction <maximumf>, %22, %cst_20 [2] : vector<4x8x8xf32> to vector<4x8xf32>
    %25 = vector.shape_cast %24 : vector<4x8xf32> to vector<4x8x1xf32>
    %26 = arith.maximumf %23, %25 : vector<4x8x1xf32>
    %27 = arith.subf %23, %26 : vector<4x8x1xf32>
    %28 = math.exp %27 : vector<4x8x1xf32>
    %29 = vector.broadcast %26 : vector<4x8x1xf32> to vector<4x8x8xf32>
    %30 = arith.subf %22, %29 : vector<4x8x8xf32>
    %31 = math.exp %30 : vector<4x8x8xf32>
    %c0_21 = arith.constant 0 : index
    %c0_22 = arith.constant 0 : index
    %c0_23 = arith.constant 0 : index
    %32 = vector.load %arg11[%c0_21, %c0_22, %c0_23] : memref<4x8x1xf32, #tpu.memory_space<vmem>>, vector<4x8x1xf32>
    %33 = arith.mulf %28, %32 : vector<4x8x1xf32>
    %cst_24 = arith.constant dense<0.000000e+00> : vector<4x8xf32>
    %34 = vector.multi_reduction <add>, %31, %cst_24 [2] : vector<4x8x8xf32> to vector<4x8xf32>
    %35 = vector.shape_cast %34 : vector<4x8xf32> to vector<4x8x1xf32>
    %36 = arith.addf %33, %35 : vector<4x8x1xf32>
    %c0_25 = arith.constant 0 : index
    %c0_26 = arith.constant 0 : index
    %c0_27 = arith.constant 0 : index
    %37 = vector.load %arg11[%c0_25, %c0_26, %c0_27] : memref<4x8x1xf32, #tpu.memory_space<vmem>>, vector<4x8x1xf32>
    tpu.vector_store %arg11[%c0_25, %c0_26, %c0_27], %36 {strides = array<i32>} : memref<4x8x1xf32, #tpu.memory_space<vmem>>, vector<4x8x1xf32>,
    %c0_28 = arith.constant 0 : index
    %c0_29 = arith.constant 0 : index
    %c0_30 = arith.constant 0 : index
    %38 = vector.load %arg12[%c0_28, %c0_29, %c0_30] : memref<4x8x32xf32, #tpu.memory_space<vmem>>, vector<4x8x32xf32>
    %39 = vector.broadcast %28 : vector<4x8x1xf32> to vector<4x8x32xf32>
    %40 = arith.mulf %39, %38 : vector<4x8x32xf32>
    %41 = arith.truncf %31 : vector<4x8x8xf32> to vector<4x8x8xbf16>
    %cst_31 = arith.constant dense<0.000000e+00> : vector<4x8x32xf32>
    %42 = tpu.matmul %41, %8, %cst_31 {dimension_numbers = #tpu.dot_dimension_numbers<[2], [1], [1], [2], [0, 0, 0, 1, 1, 2], [0], [0]>} : vector<4x8x8xbf16>, vector<4x8x32xbf16>, vector<4x8x32xf32> -> vector<4x8x32xf32>
    %43 = arith.addf %40, %42 : vector<4x8x32xf32>
    %c0_32 = arith.constant 0 : index
    %c0_33 = arith.constant 0 : index
    %c0_34 = arith.constant 0 : index
    %44 = vector.load %arg12[%c0_32, %c0_33, %c0_34] : memref<4x8x32xf32, #tpu.memory_space<vmem>>, vector<4x8x32xf32>
    tpu.vector_store %arg12[%c0_32, %c0_33, %c0_34], %43 {strides = array<i32>} : memref<4x8x32xf32, #tpu.memory_space<vmem>>, vector<4x8x32xf32>,
    %c0_35 = arith.constant 0 : index
    %c0_36 = arith.constant 0 : index
    %c0_37 = arith.constant 0 : index
    %45 = vector.load %arg10[%c0_35, %c0_36, %c0_37] : memref<4x8x1xf32, #tpu.memory_space<vmem>>, vector<4x8x1xf32>
    tpu.vector_store %arg10[%c0_35, %c0_36, %c0_37], %26 {strides = array<i32>} : memref<4x8x1xf32, #tpu.memory_space<vmem>>, vector<4x8x1xf32>,
    %c0_i32_38 = arith.constant 0 : i32
    %46 = arith.cmpi eq, %arg2, %c0_i32_38 : i32
    %47 = arith.extui %46 : i1 to i32
    %c0_i32_39 = arith.constant 0 : i32
    %48 = arith.cmpi ne, %47, %c0_i32_39 : i32
    scf.if %48 {
      %c0_40 = arith.constant 0 : index
      %c0_41 = arith.constant 0 : index
      %c0_42 = arith.constant 0 : index
      %49 = vector.load %arg12[%c0_40, %c0_41, %c0_42] : memref<4x8x32xf32, #tpu.memory_space<vmem>>, vector<4x8x32xf32>
      %c0_43 = arith.constant 0 : index
      %c0_44 = arith.constant 0 : index
      %c0_45 = arith.constant 0 : index
      %50 = vector.load %arg11[%c0_43, %c0_44, %c0_45] : memref<4x8x1xf32, #tpu.memory_space<vmem>>, vector<4x8x1xf32>
      %51 = vector.broadcast %50 : vector<4x8x1xf32> to vector<4x8x32xf32>
      %52 = arith.divf %49, %51 : vector<4x8x32xf32>
      %53 = arith.truncf %52 : vector<4x8x32xf32> to vector<4x8x32xbf16>
      %c0_46 = arith.constant 0 : index
      %c0_47 = arith.constant 0 : index
      %c0_48 = arith.constant 0 : index
      %54 = vector.load %arg7[%c0_46, %c0_47, %c0_48] : memref<1x8x128xbf16, #tpu.memory_space<vmem>>, vector<1x8x128xbf16>
      %55 = vector.shape_cast %54 : vector<1x8x128xbf16> to vector<8x128xbf16>
      %56 = arith.extf %55 : vector<8x128xbf16> to vector<8x128xf32>
      %57 = vector.extract_strided_slice %53 {offsets = [0, 0, 0], sizes = [1, 8, 32], strides = [1, 1, 1]} : vector<4x8x32xbf16> to vector<1x8x32xbf16>
      %58 = vector.shape_cast %57 : vector<1x8x32xbf16> to vector<8x32xbf16>
      %c0_49 = arith.constant 0 : index
      %c0_50 = arith.constant 0 : index
      %c0_51 = arith.constant 0 : index
      %59 = vector.load %arg8[%c0_49, %c0_50, %c0_51] : memref<4x32x128xbf16, #tpu.memory_space<vmem>>, vector<1x32x128xbf16>
      %60 = vector.shape_cast %59 : vector<1x32x128xbf16> to vector<32x128xbf16>
      %cst_52 = arith.constant dense<0.000000e+00> : vector<8x128xf32>
      %61 = tpu.matmul %58, %60, %cst_52 {dimension_numbers = #tpu.dot_dimension_numbers<[1], [0], [0], [1], [0, 0, 1, 1], [], []>} : vector<8x32xbf16>, vector<32x128xbf16>, vector<8x128xf32> -> vector<8x128xf32>
      %62 = arith.addf %56, %61 : vector<8x128xf32>
      %63 = vector.extract_strided_slice %53 {offsets = [1, 0, 0], sizes = [1, 8, 32], strides = [1, 1, 1]} : vector<4x8x32xbf16> to vector<1x8x32xbf16>
      %64 = vector.shape_cast %63 : vector<1x8x32xbf16> to vector<8x32xbf16>
      %c1 = arith.constant 1 : index
      %c0_53 = arith.constant 0 : index
      %c0_54 = arith.constant 0 : index
      %65 = vector.load %arg8[%c1, %c0_53, %c0_54] : memref<4x32x128xbf16, #tpu.memory_space<vmem>>, vector<1x32x128xbf16>
      %66 = vector.shape_cast %65 : vector<1x32x128xbf16> to vector<32x128xbf16>
      %cst_55 = arith.constant dense<0.000000e+00> : vector<8x128xf32>
      %67 = tpu.matmul %64, %66, %cst_55 {dimension_numbers = #tpu.dot_dimension_numbers<[1], [0], [0], [1], [0, 0, 1, 1], [], []>} : vector<8x32xbf16>, vector<32x128xbf16>, vector<8x128xf32> -> vector<8x128xf32>
      %68 = arith.addf %62, %67 : vector<8x128xf32>
      %69 = vector.extract_strided_slice %53 {offsets = [2, 0, 0], sizes = [1, 8, 32], strides = [1, 1, 1]} : vector<4x8x32xbf16> to vector<1x8x32xbf16>
      %70 = vector.shape_cast %69 : vector<1x8x32xbf16> to vector<8x32xbf16>
      %c2 = arith.constant 2 : index
      %c0_56 = arith.constant 0 : index
      %c0_57 = arith.constant 0 : index
      %71 = vector.load %arg8[%c2, %c0_56, %c0_57] : memref<4x32x128xbf16, #tpu.memory_space<vmem>>, vector<1x32x128xbf16>
      %72 = vector.shape_cast %71 : vector<1x32x128xbf16> to vector<32x128xbf16>
      %cst_58 = arith.constant dense<0.000000e+00> : vector<8x128xf32>
      %73 = tpu.matmul %70, %72, %cst_58 {dimension_numbers = #tpu.dot_dimension_numbers<[1], [0], [0], [1], [0, 0, 1, 1], [], []>} : vector<8x32xbf16>, vector<32x128xbf16>, vector<8x128xf32> -> vector<8x128xf32>
      %74 = arith.addf %68, %73 : vector<8x128xf32>
      %75 = vector.extract_strided_slice %53 {offsets = [3, 0, 0], sizes = [1, 8, 32], strides = [1, 1, 1]} : vector<4x8x32xbf16> to vector<1x8x32xbf16>
      %76 = vector.shape_cast %75 : vector<1x8x32xbf16> to vector<8x32xbf16>
      %c3 = arith.constant 3 : index
      %c0_59 = arith.constant 0 : index
      %c0_60 = arith.constant 0 : index
      %77 = vector.load %arg8[%c3, %c0_59, %c0_60] : memref<4x32x128xbf16, #tpu.memory_space<vmem>>, vector<1x32x128xbf16>
      %78 = vector.shape_cast %77 : vector<1x32x128xbf16> to vector<32x128xbf16>
      %cst_61 = arith.constant dense<0.000000e+00> : vector<8x128xf32>
      %79 = tpu.matmul %76, %78, %cst_61 {dimension_numbers = #tpu.dot_dimension_numbers<[1], [0], [0], [1], [0, 0, 1, 1], [], []>} : vector<8x32xbf16>, vector<32x128xbf16>, vector<8x128xf32> -> vector<8x128xf32>
      %80 = arith.addf %74, %79 : vector<8x128xf32>
      %c0_62 = arith.constant 0 : index
      %c0_63 = arith.constant 0 : index
      %c0_64 = arith.constant 0 : index
      %81 = vector.load %arg9[%c0_62, %c0_63, %c0_64] : memref<1x8x128xf32, #tpu.memory_space<vmem>>, vector<1x8x128xf32>
      %82 = vector.shape_cast %81 : vector<1x8x128xf32> to vector<8x128xf32>
      %83 = vector.shape_cast %80 : vector<8x128xf32> to vector<1x8x128xf32>
      tpu.vector_store %arg9[%c0_62, %c0_63, %c0_64], %83 {strides = array<i32>} : memref<1x8x128xf32, #tpu.memory_space<vmem>>, vector<1x8x128xf32>,
    } else {
    }
    return
  }
  func.func @transform_0(%arg0: i32, %arg1: i32, %arg2: i32) -> (i32, i32, i32, i32) {
    %c0_i32 = arith.constant 0 : i32
    %c0_i32_0 = arith.constant 0 : i32
    %c0_i32_1 = arith.constant 0 : i32
    return %arg0, %c0_i32, %arg1, %c0_i32_0 : i32, i32, i32, i32
  }
  func.func @transform_1(%arg0: i32, %arg1: i32, %arg2: i32) -> (i32, i32, i32, i32) {
    %c0_i32 = arith.constant 0 : i32
    %c0_i32_0 = arith.constant 0 : i32
    %c0_i32_1 = arith.constant 0 : i32
    return %arg0, %c0_i32, %arg2, %c0_i32_0 : i32, i32, i32, i32
  }
  func.func @transform_2(%arg0: i32, %arg1: i32, %arg2: i32) -> (i32, i32, i32, i32) {
    %c0_i32 = arith.constant 0 : i32
    %c0_i32_0 = arith.constant 0 : i32
    %c0_i32_1 = arith.constant 0 : i32
    return %arg0, %c0_i32, %arg2, %c0_i32_0 : i32, i32, i32, i32
  }
  func.func @transform_3(%arg0: i32, %arg1: i32, %arg2: i32) -> (i32, i32, i32) {
    %c0_i32 = arith.constant 0 : i32
    %c0_i32_0 = arith.constant 0 : i32
    return %arg0, %c0_i32, %arg2 : i32, i32, i32
  }
  func.func @transform_4(%arg0: i32, %arg1: i32, %arg2: i32) -> (i32, i32, i32) {
    %c0_i32 = arith.constant 0 : i32
    %c0_i32_0 = arith.constant 0 : i32
    return %arg0, %arg1, %c0_i32 : i32, i32, i32
  }
  func.func @transform_5(%arg0: i32, %arg1: i32, %arg2: i32) -> (i32, i32, i32) {
    %c0_i32 = arith.constant 0 : i32
    %c0_i32_0 = arith.constant 0 : i32
    %c0_i32_1 = arith.constant 0 : i32
    %c0_i32_2 = arith.constant 0 : i32
    return %c0_i32, %c0_i32_0, %c0_i32_1 : i32, i32, i32
  }
  func.func @transform_6(%arg0: i32, %arg1: i32, %arg2: i32) -> (i32, i32, i32) {
    %c0_i32 = arith.constant 0 : i32
    %c0_i32_0 = arith.constant 0 : i32
    return %arg0, %arg1, %c0_i32 : i32, i32, i32
  }
}

module attributes {stable_mosaic.version = 11 : i64} {
  func.func @_ffn_kernel(%arg0: i32, %arg1: memref<14x128xf32, #tpu.memory_space<vmem>>, %arg2: memref<1x128xf32, #tpu.memory_space<vmem>>, %arg3: memref<1x128xf32, #tpu.memory_space<vmem>>, %arg4: memref<128x256xbf16, #tpu.memory_space<vmem>>, %arg5: memref<1x256xf32, #tpu.memory_space<vmem>>, %arg6: memref<256x128xbf16, #tpu.memory_space<vmem>>, %arg7: memref<1x128xf32, #tpu.memory_space<vmem>>, %arg8: memref<14x128xf32, #tpu.memory_space<vmem>>) attributes {dimension_semantics = [#tpu.dimension_semantics<parallel>], iteration_bounds = array<i64: 1>, scalar_prefetch = 0 : i64, scratch_operands = 0 : i64, tpu.core_type = #tpu.core_type<tc>, window_params = [{transform_indices = @transform_0, window_bounds = array<i64: 14, 128>}, {pipeline_mode = #tpu.pipeline_mode<synchronous>, transform_indices = @transform_1, window_bounds = array<i64: 1, 128>}, {pipeline_mode = #tpu.pipeline_mode<synchronous>, transform_indices = @transform_2, window_bounds = array<i64: 1, 128>}, {pipeline_mode = #tpu.pipeline_mode<synchronous>, transform_indices = @transform_3, window_bounds = array<i64: 128, 256>}, {pipeline_mode = #tpu.pipeline_mode<synchronous>, transform_indices = @transform_4, window_bounds = array<i64: 1, 256>}, {pipeline_mode = #tpu.pipeline_mode<synchronous>, transform_indices = @transform_5, window_bounds = array<i64: 256, 128>}, {pipeline_mode = #tpu.pipeline_mode<synchronous>, transform_indices = @transform_6, window_bounds = array<i64: 1, 128>}, {transform_indices = @transform_7, window_bounds = array<i64: 14, 128>}]} {
    %c0 = arith.constant 0 : index
    %c0_0 = arith.constant 0 : index
    %0 = vector.load %arg1[%c0, %c0_0] : memref<14x128xf32, #tpu.memory_space<vmem>>, vector<14x128xf32>
    %c0_1 = arith.constant 0 : index
    %c0_2 = arith.constant 0 : index
    %1 = vector.load %arg2[%c0_1, %c0_2] : memref<1x128xf32, #tpu.memory_space<vmem>>, vector<1x128xf32>
    %c0_3 = arith.constant 0 : index
    %c0_4 = arith.constant 0 : index
    %2 = vector.load %arg3[%c0_3, %c0_4] : memref<1x128xf32, #tpu.memory_space<vmem>>, vector<1x128xf32>
    %cst = arith.constant dense<0.000000e+00> : vector<14xf32>
    %3 = vector.multi_reduction <add>, %0, %cst [1] : vector<14x128xf32> to vector<14xf32>
    %4 = vector.shape_cast %3 : vector<14xf32> to vector<14x1xf32>
    %cst_5 = arith.constant 1.280000e+02 : f32
    %5 = vector.broadcast %cst_5 : f32 to vector<14x1xf32>
    %6 = arith.divf %4, %5 : vector<14x1xf32>
    %7 = vector.broadcast %6 : vector<14x1xf32> to vector<14x128xf32>
    %8 = arith.subf %0, %7 : vector<14x128xf32>
    %9 = arith.mulf %8, %8 : vector<14x128xf32>
    %cst_6 = arith.constant dense<0.000000e+00> : vector<14xf32>
    %10 = vector.multi_reduction <add>, %9, %cst_6 [1] : vector<14x128xf32> to vector<14xf32>
    %11 = vector.shape_cast %10 : vector<14xf32> to vector<14x1xf32>
    %cst_7 = arith.constant 1.280000e+02 : f32
    %12 = vector.broadcast %cst_7 : f32 to vector<14x1xf32>
    %13 = arith.divf %11, %12 : vector<14x1xf32>
    %cst_8 = arith.constant 9.99999974E-6 : f32
    %14 = vector.broadcast %cst_8 : f32 to vector<14x1xf32>
    %15 = arith.addf %13, %14 : vector<14x1xf32>
    %16 = math.rsqrt %15 : vector<14x1xf32>
    %17 = vector.broadcast %16 : vector<14x1xf32> to vector<14x128xf32>
    %18 = arith.mulf %8, %17 : vector<14x128xf32>
    %19 = vector.broadcast %1 : vector<1x128xf32> to vector<14x128xf32>
    %20 = arith.mulf %18, %19 : vector<14x128xf32>
    %21 = vector.broadcast %2 : vector<1x128xf32> to vector<14x128xf32>
    %22 = arith.addf %20, %21 : vector<14x128xf32>
    %23 = arith.truncf %22 : vector<14x128xf32> to vector<14x128xbf16>
    %c0_9 = arith.constant 0 : index
    %c0_10 = arith.constant 0 : index
    %24 = vector.load %arg4[%c0_9, %c0_10] : memref<128x256xbf16, #tpu.memory_space<vmem>>, vector<128x256xbf16>
    %cst_11 = arith.constant dense<0.000000e+00> : vector<14x256xf32>
    %25 = tpu.matmul %23, %24, %cst_11 {dimension_numbers = #tpu.dot_dimension_numbers<[1], [0], [0], [1], [0, 0, 1, 1], [], []>} : vector<14x128xbf16>, vector<128x256xbf16>, vector<14x256xf32> -> vector<14x256xf32>
    %c0_12 = arith.constant 0 : index
    %c0_13 = arith.constant 0 : index
    %26 = vector.load %arg5[%c0_12, %c0_13] : memref<1x256xf32, #tpu.memory_space<vmem>>, vector<1x256xf32>
    %27 = vector.broadcast %26 : vector<1x256xf32> to vector<14x256xf32>
    %28 = arith.addf %25, %27 : vector<14x256xf32>
    %cst_14 = arith.constant 5.000000e-01 : f32
    %29 = vector.broadcast %cst_14 : f32 to vector<14x256xf32>
    %30 = arith.mulf %29, %28 : vector<14x256xf32>
    %cst_15 = arith.constant 4.471500e-02 : f32
    %31 = vector.broadcast %cst_15 : f32 to vector<14x256xf32>
    %32 = arith.mulf %31, %28 : vector<14x256xf32>
    %33 = arith.mulf %32, %28 : vector<14x256xf32>
    %34 = arith.mulf %33, %28 : vector<14x256xf32>
    %35 = arith.addf %28, %34 : vector<14x256xf32>
    %cst_16 = arith.constant 0.797884583 : f32
    %36 = vector.broadcast %cst_16 : f32 to vector<14x256xf32>
    %37 = arith.mulf %36, %35 : vector<14x256xf32>
    %38 = math.tanh %37 : vector<14x256xf32>
    %cst_17 = arith.constant 1.000000e+00 : f32
    %39 = vector.broadcast %cst_17 : f32 to vector<14x256xf32>
    %40 = arith.addf %39, %38 : vector<14x256xf32>
    %41 = arith.mulf %30, %40 : vector<14x256xf32>
    %42 = arith.truncf %41 : vector<14x256xf32> to vector<14x256xbf16>
    %c0_18 = arith.constant 0 : index
    %c0_19 = arith.constant 0 : index
    %43 = vector.load %arg6[%c0_18, %c0_19] : memref<256x128xbf16, #tpu.memory_space<vmem>>, vector<256x128xbf16>
    %cst_20 = arith.constant dense<0.000000e+00> : vector<14x128xf32>
    %44 = tpu.matmul %42, %43, %cst_20 {dimension_numbers = #tpu.dot_dimension_numbers<[1], [0], [0], [1], [0, 0, 1, 1], [], []>} : vector<14x256xbf16>, vector<256x128xbf16>, vector<14x128xf32> -> vector<14x128xf32>
    %c0_21 = arith.constant 0 : index
    %c0_22 = arith.constant 0 : index
    %45 = vector.load %arg7[%c0_21, %c0_22] : memref<1x128xf32, #tpu.memory_space<vmem>>, vector<1x128xf32>
    %46 = vector.broadcast %45 : vector<1x128xf32> to vector<14x128xf32>
    %47 = arith.addf %44, %46 : vector<14x128xf32>
    %48 = arith.addf %0, %47 : vector<14x128xf32>
    %c0_23 = arith.constant 0 : index
    %c0_24 = arith.constant 0 : index
    %49 = vector.load %arg8[%c0_23, %c0_24] : memref<14x128xf32, #tpu.memory_space<vmem>>, vector<14x128xf32>
    tpu.vector_store %arg8[%c0_23, %c0_24], %48 {strides = array<i32>} : memref<14x128xf32, #tpu.memory_space<vmem>>, vector<14x128xf32>,
    return
  }
  func.func @transform_0(%arg0: i32) -> (i32, i32) {
    %c0_i32 = arith.constant 0 : i32
    %c0_i32_0 = arith.constant 0 : i32
    return %arg0, %c0_i32 : i32, i32
  }
  func.func @transform_1(%arg0: i32) -> (i32, i32) {
    %c0_i32 = arith.constant 0 : i32
    %c0_i32_0 = arith.constant 0 : i32
    %c0_i32_1 = arith.constant 0 : i32
    return %c0_i32, %c0_i32_0 : i32, i32
  }
  func.func @transform_2(%arg0: i32) -> (i32, i32) {
    %c0_i32 = arith.constant 0 : i32
    %c0_i32_0 = arith.constant 0 : i32
    %c0_i32_1 = arith.constant 0 : i32
    return %c0_i32, %c0_i32_0 : i32, i32
  }
  func.func @transform_3(%arg0: i32) -> (i32, i32) {
    %c0_i32 = arith.constant 0 : i32
    %c0_i32_0 = arith.constant 0 : i32
    %c0_i32_1 = arith.constant 0 : i32
    return %c0_i32, %c0_i32_0 : i32, i32
  }
  func.func @transform_4(%arg0: i32) -> (i32, i32) {
    %c0_i32 = arith.constant 0 : i32
    %c0_i32_0 = arith.constant 0 : i32
    %c0_i32_1 = arith.constant 0 : i32
    return %c0_i32, %c0_i32_0 : i32, i32
  }
  func.func @transform_5(%arg0: i32) -> (i32, i32) {
    %c0_i32 = arith.constant 0 : i32
    %c0_i32_0 = arith.constant 0 : i32
    %c0_i32_1 = arith.constant 0 : i32
    return %c0_i32, %c0_i32_0 : i32, i32
  }
  func.func @transform_6(%arg0: i32) -> (i32, i32) {
    %c0_i32 = arith.constant 0 : i32
    %c0_i32_0 = arith.constant 0 : i32
    %c0_i32_1 = arith.constant 0 : i32
    return %c0_i32, %c0_i32_0 : i32, i32
  }
  func.func @transform_7(%arg0: i32) -> (i32, i32) {
    %c0_i32 = arith.constant 0 : i32
    %c0_i32_0 = arith.constant 0 : i32
    return %arg0, %c0_i32 : i32, i32
  }
}

</mosaic_0001>

<bundles_post_ra>
// kernel: transformer_encoder_layer_forward.3
= control target key start
LH: loop header
LB: loop body
LE: loop exit
PB: predicated region body
PF: predicated region fallthrough
CT: control target
= control target key end

     0   :  { %v495_v3 = vmov 0.0   ;;  %vm496_vm0 = vmmov 0   ;;  %v497_v36 = vmov 0   ;;  %s655_s0 = inlined_call_operand.vmem [shape: bf16[16,128], index: 0, kind: input, shape index: {}]   ;;  %s656_s5 = inlined_call_operand.vmem [shape: bf16[128,128], index: 5, kind: input, shape index: {}]   ;;  %s657_s4 = inlined_call_operand.vmem [shape: bf16[128,256], index: 4, kind: input, shape index: {}]   ;;  %s658_s2 = inlined_call_operand.vmem [shape: f32[1,128], index: 2, kind: input, shape index: {}]   ;;  %s659_s3 = inlined_call_operand.vmem [shape: f32[1,128], index: 3, kind: input, shape index: {}]   ;;  %s660_s1 = inlined_call_operand.vmem [shape: bf16[16,128], index: 1, kind: input, shape index: {}]   ;;  %s661_s8 = inlined_call_operand.vmem [shape: bf16[16,128], index: 8, kind: output, shape index: {2}]   ;;  %s662_s6 = inlined_call_operand.vmem [shape: bf16[16,128], index: 6, kind: output, shape index: {0}]   ;;  %s663_s7 = inlined_call_operand.vmem [shape: bf16[16,128], index: 7, kind: output, shape index: {1}]  }
   0x1   :  { %v405_v0 = vld [vmem:[%s655_s0] sm:$0xff]   ;;  %436 = vmatprep.subr.bf16.mxu1 %v495_v3  ;;  %v459_v4 = vld [vmem:[%s656_s5 + $0x38] sm:$0xff]   ;;  %v463_v15 = vld [vmem:[%s656_s5 + $0x30] sm:$0xff]   ;;  %452 = vmatprep.mubr.msk.bf16.mxu1 %vm496_vm0, %v495_v3 }
   0x2   :  { %v406_v1 = vunpack.c.l.bf16 %v405_v0  ;;  %v407_v2 = vunpack.c.h.bf16 %v405_v0  ;;  %437 = vmatpush3.bf16.msra.mxu1 %v459_v4  ;;  %v460_v13 = vld [vmem:[%s657_s4 + $0x74] ss:$8 sps:$4 sm:$0xff]   ;;  %v462_v14 = vld [vmem:[%s657_s4 + $0x70] ss:$8 sps:$4 sm:$0xff]   ;;  %v464_v16 = vld [vmem:[%s657_s4 + $0x64] ss:$8 sps:$4 sm:$0xff]   ;;  %208 = vmatprep.mubr.bf16.mxu0 %v497_v36 }
   0x3   :  { %438 = vmatprep.subr.bf16.mxu1 %v495_v3  ;;  %176 = vmatprep.subr.bf16.mxu0 %v460_v13  ;;  %v466_v17 = vld [vmem:[%s657_s4 + $0x60] ss:$8 sps:$4 sm:$0xff]   ;;  %v468_v19 = vld [vmem:[%s657_s4 + $0x54] ss:$8 sps:$4 sm:$0xff]   ;;  %v470_v20 = vld [vmem:[%s657_s4 + $0x50] ss:$8 sps:$4 sm:$0xff]  }
   0x4   :  { %33 = vadd.xlane.f32.xlu0 %v406_v1  ;;  %177 = vmatpush1.bf16.msra.mxu0 %v462_v14  ;;  %v467_v18 = vld [vmem:[%s656_s5 + $0x28] sm:$0xff]   ;;  %v471_v21 = vld [vmem:[%s656_s5 + $0x20] sm:$0xff]   ;;  %v476_v24 = vld [vmem:[%s657_s4 + $0x34] ss:$8 sps:$4 sm:$0xff]  }
   0x5   :  { %178 = vmatprep.subr.bf16.mxu0 %v464_v16  ;;  %v472_v22 = vld [vmem:[%s657_s4 + $0x44] ss:$8 sps:$4 sm:$0xff]   ;;  %v474_v23 = vld [vmem:[%s657_s4 + $0x40] ss:$8 sps:$4 sm:$0xff]   ;;  %v475_v25 = vld [vmem:[%s656_s5 + $0x18] sm:$0xff]  }
   0x6   :  { %439 = vmatpush3.bf16.msra.mxu1 %v463_v15  ;;  %v478_v26 = vld [vmem:[%s657_s4 + $0x30] ss:$8 sps:$4 sm:$0xff]   ;;  %v480_v27 = vld [vmem:[%s657_s4 + $0x24] ss:$8 sps:$4 sm:$0xff]   ;;  %v482_v29 = vld [vmem:[%s657_s4 + $0x20] ss:$8 sps:$4 sm:$0xff]  }
   0x7   :  { %440 = vmatprep.subr.bf16.mxu1 %v495_v3  ;;  %v479_v28 = vld [vmem:[%s656_s5 + $0x10] sm:$0xff]   ;;  %v483_v31 = vld [vmem:[%s656_s5 + $0x8] sm:$0xff]   ;;  %v487_v34 = vld [vmem:[%s656_s5] sm:$0xff]  }
   0x8   :  { %35 = vadd.xlane.f32.xlu0 %v407_v2  ;;  %179 = vmatpush1.bf16.msra.mxu0 %v466_v17  ;;  %v484_v30 = vld [vmem:[%s657_s4 + $0x14] ss:$8 sps:$4 sm:$0xff]   ;;  %v486_v32 = vld [vmem:[%s657_s4 + $0x10] ss:$8 sps:$4 sm:$0xff]   ;;  %v488_v33 = vld [vmem:[%s657_s4 + $0x4] ss:$8 sps:$4 sm:$0xff]  }
   0x9   :  { %180 = vmatprep.subr.bf16.mxu0 %v468_v19  ;;  %v490_v35 = vld [vmem:[%s657_s4] ss:$8 sps:$4 sm:$0xff]  }
   0xa   :  { %441 = vmatpush3.bf16.msra.mxu1 %v467_v18  ;;  %v366_v44 = vld [vmem:[%s658_s2] ss:$0 sm:$0xff] }
   0xb   :  { %442 = vmatprep.subr.bf16.mxu1 %v495_v3  ;;  %v367_v48 = vld [vmem:[%s659_s3] ss:$0 sm:$0xff] }
   0xc   :  { %181 = vmatpush1.bf16.msra.mxu0 %v470_v20  ;;  %v409_v49 = vld [vmem:[%s660_s1] sm:$0xff]  }
   0xd   :  { %182 = vmatprep.subr.bf16.mxu0 %v472_v22  ;;  %v410_v53 = vunpack.c.l.bf16 %v409_v49  ;;  %v411_v54 = vunpack.c.h.bf16 %v409_v49 }
   0xe   :  { %443 = vmatpush3.bf16.msra.mxu1 %v471_v21 }
   0xf   :  { %444 = vmatprep.subr.bf16.mxu1 %v495_v3 }
  0x10   :  { %183 = vmatpush1.bf16.msra.mxu0 %v474_v23 }
  0x11   :  { %184 = vmatprep.subr.bf16.mxu0 %v476_v24 }
  0x12   :  { %445 = vmatpush3.bf16.msra.mxu1 %v475_v25 }
  0x13   :  { %446 = vmatprep.subr.bf16.mxu1 %v495_v3 }
  0x14   :  { %185 = vmatpush1.bf16.msra.mxu0 %v478_v26 }
  0x15   :  { %186 = vmatprep.subr.bf16.mxu0 %v480_v27 }
  0x16   :  { %447 = vmatpush3.bf16.msra.mxu1 %v479_v28 }
  0x17   :  { %448 = vmatprep.subr.bf16.mxu1 %v495_v3 }
  0x18   :  { %187 = vmatpush1.bf16.msra.mxu0 %v482_v29 }
  0x19   :  { %188 = vmatprep.subr.bf16.mxu0 %v484_v30 }
  0x1a   :  { %449 = vmatpush3.bf16.msra.mxu1 %v483_v31 }
  0x1b   :  { %450 = vmatprep.subr.bf16.mxu1 %v495_v3 }
  0x1c   :  { %189 = vmatpush1.bf16.msra.mxu0 %v486_v32 }
  0x1d   :  { %190 = vmatprep.subr.bf16.mxu0 %v488_v33 }
  0x1e   :  { %451 = vmatpush3.bf16.msra.mxu1 %v487_v34 }
  0x20   :  { %191 = vmatpush1.bf16.msra.mxu0 %v490_v35 }
  0x8d   :  { %v34_v5 = vpop.xlane.xlu0 %33 }
  0x8e   :  { %v38_v6 = vmul.f32 0.0078125, %v34_v5 }
  0x90   :  { %v551_v7 = vsub.f32 %v406_v1, %v38_v6 }
  0x91   :  { %v36_v8 = vpop.xlane.xlu0 %35 }
  0x92   :  { %v39_v9 = vmul.f32 0.0078125, %v36_v8  ;;  %v42_v10 = vmul.f32 %v551_v7, %v551_v7 }
  0x94   :  { %v555_v11 = vsub.f32 %v407_v2, %v39_v9  ;;  %44 = vadd.xlane.f32.xlu1 %v42_v10 }
  0x96   :  { %v43_v12 = vmul.f32 %v555_v11, %v555_v11 }
  0x98   :  { %46 = vadd.xlane.f32.xlu1 %v43_v12 }
 0x11d   :  { %v45_v37 = vpop.xlane.xlu1 %44 }
 0x11e   :  { %v48_v38 = vmul.f32 0.0078125, %v45_v37 }
 0x120   :  { %v50_v39 = vadd.f32 1e-05, %v48_v38 }
 0x121   :  { %v47_v40 = vpop.xlane.xlu1 %46 }
 0x122   :  { %491 = vrsqrt.f32 %v50_v39  ;;  %v49_v41 = vmul.f32 0.0078125, %v47_v40 }
 0x124   :  { %v51_v42 = vadd.f32 1e-05, %v49_v41 }
 0x126   :  { %493 = vrsqrt.f32 %v51_v42 }
 0x12f   :  { %v492_v43 = vpop.eup %491 }
 0x130   :  { %v54_v45 = vmul.f32 %v492_v43, %v551_v7 }
 0x132   :  { %v62_v46 = vmul.f32 %v366_v44, %v54_v45 }
 0x133   :  { %v494_v47 = vpop.eup %493 }
 0x134   :  { %v55_v50 = vmul.f32 %v494_v47, %v555_v11  ;;  %v70_v52 = vadd.f32 %v367_v48, %v62_v46 }
 0x136   :  { %v63_v51 = vmul.f32 %v366_v44, %v55_v50  ;;  %v76_v57 = vadd.f32 %v410_v53, %v70_v52 }
 0x138   :  { %v71_v55 = vadd.f32 %v367_v48, %v63_v51 }
 0x13a   :  { %v79_v56 = vpack.c.bf16 %v71_v55, %v70_v52  ;;  %v77_v58 = vadd.f32 %v411_v54, %v71_v55 }
 0x13c   :  { %453 = vmatmul.mubr.bf16.vlgmr.msra.gmra.mxu1 %v79_v56  ;;  %v78_v59 = vpack.c.bf16 %v77_v58, %v76_v57 }
 0x13e   :  { %209 = vmatmul.mubr.bf16.vlgmr.msra.gmra.mxu0 %v78_v59 }
 0x1fc   :  { %v337_v60 = vpop.f32.mrf.mxu1 }
 0x1fe   :  { %v210_v61 = vpop.f32.mrf.mxu0  ;;  %v454_v62 = vpop.f32.mrf.mxu1 }
 0x200   :  { %v212_v63 = vpop.f32.mrf.mxu0  ;;  %v340_v0 = vpop.f32.mrf.mxu1 }
 0x201   :  { %v425_v1 = vpack.c.bf16 %v340_v0, %v337_v60 }
 0x202   :  { %v214_v2 = vpop.f32.mrf.mxu0  ;;  %v455_v3 = vpop.f32.mrf.mxu1 }
 0x203   :  { %426 = vst [vmem:[%s661_s8] sm:$0xff] %v425_v1   ;;  %v415_v4 = vpack.c.bf16 %v214_v2, %v210_v61 }
 0x204   :  { %v216_v5 = vpop.f32.mrf.mxu0 }
 0x205   :  { %416 = vst [vmem:[%s662_s6] sm:$0xff] %v415_v4   ;;  %v420_v6 = vpack.c.bf16 %v216_v5, %v212_v63 }
 0x207   :  { %421 = vst [vmem:[%s663_s7] sm:$0xff] %v420_v6  }

// kernel: transformer_encoder_layer_forward.5
= control target key start
LH: loop header
LB: loop body
LE: loop exit
PB: predicated region body
PF: predicated region fallthrough
CT: control target
= control target key end

     0   :  { %vm34_vm0 = vcmask 1045504   ;;  %s768_s0 = inlined_call_operand.vmem [shape: f32[14,128], index: 0, kind: input, shape index: {}]   ;;  %s769_s1 = inlined_call_operand.vmem [shape: f32[1,128], index: 1, kind: input, shape index: {}]   ;;  %s770_s2 = inlined_call_operand.vmem [shape: f32[1,128], index: 2, kind: input, shape index: {}]   ;;  %s771_s3 = inlined_call_operand.vmem [shape: bf16[128,256], index: 3, kind: input, shape index: {}]   ;;  %s772_s4 = inlined_call_operand.vmem [shape: f32[1,256], index: 4, kind: input, shape index: {}]   ;;  %s773_s5 = inlined_call_operand.vmem [shape: bf16[256,128], index: 5, kind: input, shape index: {}]   ;;  %s774_s6 = inlined_call_operand.vmem [shape: f32[1,128], index: 6, kind: input, shape index: {}]   ;;  %s775_s7 = inlined_call_operand.hbm [shape: f32[14,128], index: 7, kind: output, shape index: {}]  }
   0x1   :  { %v642_v0 = vld [vmem:[%s768_s0 + $0x8] sm:$0x3f]  ;;  %v649_v2 = vld [vmem:[%s768_s0] sm:$0xff] }
   0x2   :  { %v35_v1 = vsel %vm34_vm0, %v642_v0, 0.0 }
   0x3   :  { %36 = vadd.xlane.f32.xlu0 %v35_v1 }
   0x7   :  { %32 = vadd.xlane.f32.xlu0 %v649_v2 }
   0x8   :  { %12 = vsyncpa [#allocation3], 0  ;;  %v521_v3 = vld [vmem:[%s771_s3 + $0x74] ss:$8 sps:$4 sm:$0xff]   ;;  %v523_v4 = vld [vmem:[%s771_s3 + $0x70] ss:$8 sps:$4 sm:$0xff]   ;;  %v93_v62 = vlaneseq }
   0x9   :  { %183 = vmatprep.subr.bf16.mxu0 %v521_v3  ;;  %v524_v14 = vld [vmem:[%s771_s3 + $0x64] ss:$8 sps:$4 sm:$0xff]   ;;  %v526_v15 = vld [vmem:[%s771_s3 + $0x60] ss:$8 sps:$4 sm:$0xff]   ;;  %v527_v16 = vld [vmem:[%s771_s3 + $0x54] ss:$8 sps:$4 sm:$0xff]  }
   0xa   :  { %184 = vmatpush1.bf16.msra.mxu0 %v523_v4  ;;  %v529_v17 = vld [vmem:[%s771_s3 + $0x50] ss:$8 sps:$4 sm:$0xff]   ;;  %v530_v18 = vld [vmem:[%s771_s3 + $0x44] ss:$8 sps:$4 sm:$0xff]   ;;  %v532_v19 = vld [vmem:[%s771_s3 + $0x40] ss:$8 sps:$4 sm:$0xff]  }
   0xb   :  { %185 = vmatprep.subr.bf16.mxu0 %v524_v14  ;;  %v533_v20 = vld [vmem:[%s771_s3 + $0x34] ss:$8 sps:$4 sm:$0xff]   ;;  %v535_v21 = vld [vmem:[%s771_s3 + $0x30] ss:$8 sps:$4 sm:$0xff]   ;;  %v536_v22 = vld [vmem:[%s771_s3 + $0x24] ss:$8 sps:$4 sm:$0xff]  }
   0xc   :  { %v595_v23 = vmov 0   ;;  %v538_v24 = vld [vmem:[%s771_s3 + $0x20] ss:$8 sps:$4 sm:$0xff]   ;;  %v539_v25 = vld [vmem:[%s771_s3 + $0x14] ss:$8 sps:$4 sm:$0xff]   ;;  %v94_v63 = vshrl.u32 %v93_v62, 7 }
   0xd   :  { %215 = vmatprep.mubr.bf16.mxu0 %v595_v23  ;;  %v541_v26 = vld [vmem:[%s771_s3 + $0x10] ss:$8 sps:$4 sm:$0xff]   ;;  %v542_v27 = vld [vmem:[%s771_s3 + $0x4] ss:$8 sps:$4 sm:$0xff]   ;;  %v544_v28 = vld [vmem:[%s771_s3] ss:$8 sps:$4 sm:$0xff]  }
   0xe   :  { %186 = vmatpush1.bf16.msra.mxu0 %v526_v15  ;;  %v460_v37 = vld [vmem:[%s769_s1] ss:$0 sm:$0xff]  ;;  %v545_v46 = vld [vmem:[%s773_s5 + $0x78] sm:$0xff]   ;;  %v547_v48 = vld [vmem:[%s773_s5 + $0x70] sm:$0xff]   ;;  %v95_v1 = vsub.s32 0, %v94_v63  ;;  %v99_v4 = vsub.s32 1, %v94_v63 }
   0xf   :  { %187 = vmatprep.subr.bf16.mxu0 %v527_v16  ;;  %v461_v41 = vld [vmem:[%s770_s2] ss:$0 sm:$0xff]  ;;  %v546_v47 = vld [vmem:[%s773_s5 + $0x38] sm:$0xff]   ;;  %495 = vmatprep.subr.bf16.mxu1 %v545_v46  ;;  %v548_v49 = vld [vmem:[%s773_s5 + $0x30] sm:$0xff]   ;;  %s596_s20 = smov [#allocation2]  }
  0x10   :  { %496 = vmatpush3.bf16.msra.mxu1 %v546_v47  ;;  %v549_v50 = vld [vmem:[%s773_s5 + $0x68] sm:$0xff]   ;;  %v551_v52 = vld [vmem:[%s773_s5 + $0x60] sm:$0xff]   ;;  %v553_v54 = vld [vmem:[%s773_s5 + $0x58] sm:$0xff]   ;;  %s449_s21 = sshll.u32 %s596_s20, 4  ;;  %s450_s21 = int_to_ptr.vmem [resolvable:$true] %s449_s21 }
  0x11   :  { %497 = vmatprep.subr.bf16.mxu1 %v547_v48  ;;  %v550_v51 = vld [vmem:[%s773_s5 + $0x28] sm:$0xff]   ;;  %v552_v53 = vld [vmem:[%s773_s5 + $0x20] sm:$0xff]   ;;  %v554_v55 = vld [vmem:[%s773_s5 + $0x18] sm:$0xff]   ;;  %s573_s22 = scalar_lea.vmem %s450_s21, 256  ;;  %p578_p1 = scmp.lt.s32.totalorder %s450_s21, %s450_s21 }
  0x12   :  { %188 = vmatpush1.bf16.msra.mxu0 %v529_v17  ;;  %v555_v56 = vld [vmem:[%s773_s5 + $0x50] sm:$0xff]   ;;  %v557_v58 = vld [vmem:[%s773_s5 + $0x48] sm:$0xff]   ;;  %v559_v60 = vld [vmem:[%s773_s5 + $0x40] sm:$0xff]   ;;  %p574_p0 = scmp.ne.s32.totalorder %s450_s21, %s573_s22  ;;  %p579_p2 = scmp.lt.s32.totalorder %s573_s22, %s573_s22 }
  0x13   :  { %189 = vmatprep.subr.bf16.mxu0 %v530_v18  ;;  %v556_v57 = vld [vmem:[%s773_s5 + $0x10] sm:$0xff]   ;;  %v558_v59 = vld [vmem:[%s773_s5 + $0x8] sm:$0xff]   ;;  %v560_v61 = vld [vmem:[%s773_s5] sm:$0xff]  }
  0x14   :  { %498 = vmatpush3.bf16.msra.mxu1 %v548_v49  ;;  %v91_v3 = vld [vmem:[%s772_s4] sm:$0x3]  ;;  %p580_p3 = por %p579_p2, %p578_p1 }
  0x15   :  { %499 = vmatprep.subr.bf16.mxu1 %v549_v50 }
  0x16   :  { %190 = vmatpush1.bf16.msra.mxu0 %v532_v19  ;;  %p581_p4 = pnand %p580_p3, %p574_p0 }
  0x17   :  { %191 = vmatprep.subr.bf16.mxu0 %v533_v20 }
  0x18   :  { %500 = vmatpush3.bf16.msra.mxu1 %v550_v51 }
  0x19   :  { %501 = vmatprep.subr.bf16.mxu1 %v551_v52 }
  0x1a   :  { %192 = vmatpush1.bf16.msra.mxu0 %v535_v21 }
  0x1b   :  { %193 = vmatprep.subr.bf16.mxu0 %v536_v22 }
  0x1c   :  { %502 = vmatpush3.bf16.msra.mxu1 %v552_v53 }
  0x1d   :  { %503 = vmatprep.subr.bf16.mxu1 %v553_v54  ;;  %v478_v54 = vld [vmem:[%s774_s6] ss:$0 sm:$0xff] }
  0x1e   :  { %194 = vmatpush1.bf16.msra.mxu0 %v538_v24 }
  0x1f   :  { %195 = vmatprep.subr.bf16.mxu0 %v539_v25 }
  0x20   :  { %504 = vmatpush3.bf16.msra.mxu1 %v554_v55 }
  0x21   :  { %505 = vmatprep.subr.bf16.mxu1 %v555_v56 }
  0x22   :  { %196 = vmatpush1.bf16.msra.mxu0 %v541_v26 }
  0x23   :  { %197 = vmatprep.subr.bf16.mxu0 %v542_v27 }
  0x24   :  { %506 = vmatpush3.bf16.msra.mxu1 %v556_v57 }
  0x25   :  { %507 = vmatprep.subr.bf16.mxu1 %v557_v58 }
  0x26   :  { %198 = vmatpush1.bf16.msra.mxu0 %v544_v28 }
  0x28   :  { %508 = vmatpush3.bf16.msra.mxu1 %v558_v59 }
  0x29   :  { %509 = vmatprep.subr.bf16.mxu1 %v559_v60 }
  0x2c   :  { %510 = vmatpush3.bf16.msra.mxu1 %v560_v61 }
  0x8c   :  { %v37_v5 = vpop.xlane.xlu0 %36 }
  0x8d   :  { %v40_v6 = vmul.f32 0.0078125, %v37_v5  ;;  %v96_v5 = vrot.slane %v91_v3, %v95_v1 }
  0x8f   :  { %v42_v9 = vsub.f32 %v642_v0, %v40_v6  ;;  %v100_v6 = vrot.slane %v91_v3, %v99_v4 }
  0x90   :  { %v33_v7 = vpop.xlane.xlu0 %32 }
  0x91   :  { %v39_v8 = vmul.f32 0.0078125, %v33_v7  ;;  %v44_v12 = vmul.f32 %v42_v9, %v42_v9 }
  0x93   :  { %v41_v10 = vsub.f32 %v649_v2, %v39_v8  ;;  %v47_v13 = vsel %vm34_vm0, %v44_v12, 0.0 }
  0x95   :  { %v43_v11 = vmul.f32 %v41_v10, %v41_v10 }
  0x97   :  { %45 = vadd.xlane.f32.xlu1 %v43_v11 }
  0x9b   :  { %48 = vadd.xlane.f32.xlu1 %v47_v13 }
 0x120   :  { %v46_v29 = vpop.xlane.xlu1 %45 }
 0x121   :  { %v50_v30 = vmul.f32 0.0078125, %v46_v29 }
 0x123   :  { %v52_v31 = vadd.f32 1e-05, %v50_v30 }
 0x124   :  { %v49_v32 = vpop.xlane.xlu1 %48 }
 0x125   :  { %561 = vrsqrt.f32 %v52_v31  ;;  %v51_v33 = vmul.f32 0.0078125, %v49_v32 }
 0x127   :  { %v53_v34 = vadd.f32 1e-05, %v51_v33 }
 0x129   :  { %563 = vrsqrt.f32 %v53_v34 }
 0x132   :  { %v562_v35 = vpop.eup %561 }
 0x133   :  { %v56_v36 = vmul.f32 %v562_v35, %v41_v10 }
 0x135   :  { %v64_v40 = vmul.f32 %v460_v37, %v56_v36 }
 0x136   :  { %v564_v38 = vpop.eup %563 }
 0x137   :  { %v57_v39 = vmul.f32 %v564_v38, %v42_v9  ;;  %v72_v43 = vadd.f32 %v461_v41, %v64_v40 }
 0x139   :  { %v65_v42 = vmul.f32 %v460_v37, %v57_v39 }
 0x13b   :  { %v73_v44 = vadd.f32 %v461_v41, %v65_v42 }
 0x13d   :  { %v74_v45 = vpack.c.bf16 %v73_v44, %v72_v43 }
 0x13f   :  { %216 = vmatmul.mubr.bf16.vlgmr.msra.gmra.mxu0 %v74_v45 }
 0x1ff   :  { %v217_v7 = vpop.f32.mrf.mxu0 }
 0x200   :  { %v218_v8 = vadd.f32 %v217_v7, %v96_v5 }
 0x201   :  { %v219_v9 = vpop.f32.mrf.mxu0 }
 0x202   :  { %v230_v10 = vmul.f32 0.044715, %v218_v8  ;;  %v220_v11 = vadd.f32 %v219_v9, %v100_v6  ;;  %v226_v46 = vmul.f32 0.5, %v218_v8 }
 0x203   :  { %v221_v12 = vpop.f32.mrf.mxu0 }
 0x204   :  { %v234_v13 = vmul.f32 %v230_v10, %v218_v8  ;;  %v231_v14 = vmul.f32 0.044715, %v220_v11  ;;  %v222_v15 = vadd.f32 %v221_v12, %v96_v5  ;;  %v227_v43 = vmul.f32 0.5, %v220_v11 }
 0x205   :  { %v223_v16 = vpop.f32.mrf.mxu0 }
 0x206   :  { %v238_v17 = vmul.f32 %v234_v13, %v218_v8  ;;  %v232_v18 = vmul.f32 0.044715, %v222_v15  ;;  %v224_v19 = vadd.f32 %v223_v16, %v100_v6  ;;  %v235_v20 = vmul.f32 %v231_v14, %v220_v11 }
 0x207   :  { %v228_v41 = vmul.f32 0.5, %v222_v15 }
 0x208   :  { %v236_v21 = vmul.f32 %v232_v18, %v222_v15  ;;  %v233_v22 = vmul.f32 0.044715, %v224_v19  ;;  %v239_v23 = vmul.f32 %v235_v20, %v220_v11  ;;  %v242_v24 = vadd.f32 %v238_v17, %v218_v8 }
 0x209   :  { %v229_v44 = vmul.f32 0.5, %v224_v19 }
 0x20a   :  { %v240_v25 = vmul.f32 %v236_v21, %v222_v15  ;;  %v237_v26 = vmul.f32 %v233_v22, %v224_v19  ;;  %v243_v27 = vadd.f32 %v239_v23, %v220_v11  ;;  %v246_v28 = vmul.f32 0.7978846, %v242_v24 }
 0x20c   :  { %v241_v29 = vmul.f32 %v237_v26, %v224_v19  ;;  %v247_v30 = vmul.f32 0.7978846, %v243_v27  ;;  %v244_v31 = vadd.f32 %v240_v25, %v222_v15 }
 0x20e   :  { %v245_v32 = vadd.f32 %v241_v29, %v224_v19  ;;  %565 = vtanh.f32 %v247_v30  ;;  %v248_v33 = vmul.f32 0.7978846, %v244_v31 }
 0x20f   :  { %567 = vtanh.f32 %v246_v28 }
 0x210   :  { %v249_v34 = vmul.f32 0.7978846, %v245_v32  ;;  %569 = vtanh.f32 %v248_v33 }
 0x212   :  { %571 = vtanh.f32 %v249_v34 }
 0x21b   :  { %v566_v35 = vpop.eup %565 }
 0x21c   :  { %v568_v36 = vpop.eup %567  ;;  %v255_v38 = vadd.f32 1.0, %v566_v35 }
 0x21d   :  { %v570_v37 = vpop.eup %569  ;;  %v254_v42 = vadd.f32 1.0, %v568_v36 }
 0x21e   :  { %v256_v39 = vadd.f32 1.0, %v570_v37  ;;  %v259_v48 = vmul.f32 %v255_v38, %v227_v43 }
 0x21f   :  { %v572_v40 = vpop.eup %571  ;;  %v258_v50 = vmul.f32 %v254_v42, %v226_v46 }
 0x220   :  { %v257_v45 = vadd.f32 1.0, %v572_v40  ;;  %v260_v47 = vmul.f32 %v256_v39, %v228_v41 }
 0x222   :  { %v261_v49 = vmul.f32 %v257_v45, %v229_v44  ;;  %v262_v52 = vpack.c.bf16 %v260_v47, %v258_v50 }
 0x224   :  { %v263_v51 = vpack.c.bf16 %v261_v49, %v259_v48 }
 0x226   :  { %431 = vmatprep.mubr.bf16.mxu1 %v263_v51 }
 0x227   :  { %432 = vmatmul.mubr.bf16.vlgmr.msra.gmra.mxu1 %v262_v52 }
 0x2e7   :  { %v511_v53 = vpop.f32.mrf.mxu1 }
 0x2e9   :  { %v512_v55 = vpop.f32.mrf.mxu1 }
 0x2ea   :  { %v513_v56 = vadd.f32 %v512_v55, %v511_v53 }
 0x2eb   :  { %v514_v57 = vpop.f32.mrf.mxu1 }
 0x2ec   :  { %v434_v58 = vadd.f32 %v513_v56, %v478_v54 }
 0x2ed   :  { %v515_v59 = vpop.f32.mrf.mxu1 }
 0x2ee   :  { %v440_v60 = vadd.f32 %v434_v58, %v649_v2  ;;  %v516_v61 = vadd.f32 %v515_v59, %v514_v57 }
 0x2f0   :  { %442 = vst [vmem:[#allocation2] sm:$0xff] %v440_v60  ;;  %v437_v62 = vadd.f32 %v516_v61, %v478_v54 }
 0x2f2   :  { %v441_v63 = vadd.f32 %v437_v62, %v642_v0 }
 0x2f4   :  { %443 = vst [vmem:[#allocation2 + $0x8] sm:$0x3f] %v441_v63 }
 0x2f5   :  { %584 = shalt.err (!%p581_p4)
}
 0x2f6   :  { %s597_s6 = smov 128   ;;  %s598_s23 = smov 8  }
 0x2f7   :  { %455 = dma.vmem_to_hbm [thread:$0]  %s450_s21, 256, %s775_s7, [#allocation3], %s597_s6, %s597_s6, %s598_s23  }
 0x2f8   :  { %593 = dma.done.wait [#allocation3], 256  }
 0x2f9   :  { %594 = vsyncadd [#allocation3], 4294967040 }
 0x2fa   :  { %459 = vsyncpa [#allocation3], 1 }

// kernel: transformer_encoder_layer_forward.4
= control target key start
LH: loop header
LB: loop body
LE: loop exit
PB: predicated region body
PF: predicated region fallthrough
CT: control target
= control target key end

     0   :  { %s1677_s21 = smov 0   ;;  %s1679_s22 = smov 0   ;;  %s1917_s0 = inlined_call_operand.vmem [shape: bf16[2,4,8,32], index: 0, kind: input, shape index: {}]   ;;  %s1918_s1 = inlined_call_operand.vmem [shape: bf16[2,4,8,32], index: 1, kind: input, shape index: {}]   ;;  %s1919_s2 = inlined_call_operand.vmem [shape: bf16[2,4,8,32], index: 2, kind: input, shape index: {}]   ;;  %s1920_s3 = inlined_call_operand.vmem [shape: f32[2,1,8], index: 3, kind: input, shape index: {}]   ;;  %s1921_s4 = inlined_call_operand.vmem [shape: bf16[2,8,128], index: 4, kind: input, shape index: {}]   ;;  %s1922_s5 = inlined_call_operand.vmem [shape: bf16[4,32,128], index: 5, kind: input, shape index: {}]   ;;  %s1923_s6 = inlined_call_operand.vmem [shape: f32[2,8,128], index: 6, kind: output, shape index: {}]  }
   0x1   :  { %s1681_s23 = smov 0  }
   0x2 LB: > { %s35_s24 = sadd.s32 1, %s1632_s22  ;;  %p1397_p0 = scmp.ge.s32.totalorder %s1636_s23, 1  ;;  %s1636_s23 = sphi %s1681_s23, %s16_s23   ;;  %s1632_s22 = sphi %s1679_s22, %s1925_s22   ;;  %s1628_s21 = sphi %s1677_s21, %s1924_s21  }
   0x3   : > { %p37_p1 = scmp.ge.s32.totalorder %s35_s24, 2  ;;  %p295_p2 = scmp.lt.s32.totalorder %s1636_s23, 3 }
   0x5   : > { %s1927_s24 = smov (%p37_p1, %s35_s24), 0  ;;  %p296_p3 = pnand %p1397_p0, %p295_p2 }
   0x6   : > { %p359_p4 = scmp.lt.s32.totalorder (!%p296_p3), %s1628_s21, 1 }
   0x7   : > { %299 = sbr.rel (%p296_p3) target bundleno = 1007 (0x3ef), region = 44 }
   0xc   : > { %vm417_vm0 = vcmask 261120   ;;  %v1638_v0 = vmov 0.0   ;;  %s1929_s21 = smov (!%p359_p4, %s1628_s21), 1  ;;  %vm1639_vm1 = vmmov 0   ;;  %vm408_vm2 = vcmask 7168  }
   0xd   : > { %1472 = vmatprep.subr.bf16.mxu0 %v1638_v0  ;;  %1478 = vmatprep.subr.bf16.mxu1 %v1638_v0  ;;  %418 = vst.msk [vmem:[#allocation4] sm:$0xff] %vm417_vm0, %v1638_v0  ;;  %419 = vst.msk [vmem:[#allocation4 + $0x8] sm:$0xff] %vm417_vm0, %v1638_v0  ;;  %s1712_s25 = sshll.u32 %s1929_s21, 4  ;;  %v1640_v13 = vmov -1e+30   ;;  %v435_v14 = vlaneseq  ;;  %s388_s10 = scalar_lea.vmem %s1920_s3, %s1929_s21  ;;  %vm642_vm4 = vcmask 64512  }
   0xe   : > { %420 = vst.msk [vmem:[#allocation4 + $0x10] sm:$0xff] %vm417_vm0, %v1638_v0  ;;  %421 = vst.msk [vmem:[#allocation4 + $0x18] sm:$0xff] %vm417_vm0, %v1638_v0  ;;  %1474 = vmatprep.mubr.msk.bf16.mxu0 %vm1639_vm1, %v1638_v0  ;;  %1480 = vmatprep.mubr.msk.bf16.mxu1 %vm1639_vm1, %v1638_v0  ;;  %s374_s28 = scalar_lea.vmem %s1918_s1, %s1712_s25  ;;  %s366_s7 = scalar_lea.vmem %s1917_s0, %s1712_s25  ;;  %v1406_v16 = vld [vmem:[%s388_s10] ss:$0 sm:$0xff]  ;;  %v1641_v45 = vmov 0   ;;  %vm767_vm5 = vcmask 1043456  }
   0xf   : > { %v426_v1 = vld [vmem:[%s374_s28] sm:$0xf]  ;;  %v427_v2 = vld [vmem:[%s374_s28 + $0x4] sm:$0xf]  ;;  %v428_v5 = vld [vmem:[%s374_s28 + $0x8] sm:$0xf]  ;;  %1580 = vset.pattern.permute.xlu0 %v1641_v45  ;;  %1581 = vset.pattern.permute.xlu1 %v1641_v45  ;;  %s382_s13 = scalar_lea.vmem %s1919_s2, %s1712_s25 }
  0x10   : > { %v452_v3 = vsel %vm417_vm0, %v426_v1, 0  ;;  %v498_v4 = vsel %vm417_vm0, %v427_v2, 0  ;;  %v429_v6 = vld [vmem:[%s374_s28 + $0xc] sm:$0xf]  ;;  %v422_v7 = vld [vmem:[%s366_s7] sm:$0xf] }
  0x11   : > { %1473 = vmatpush3.bf16.xpose.msra.mxu0 %v452_v3  ;;  %1479 = vmatpush3.bf16.xpose.msra.mxu1 %v498_v4  ;;  %v423_v8 = vld [vmem:[%s366_s7 + $0x4] sm:$0xf]  ;;  %v544_v9 = vsel %vm417_vm0, %v428_v5, 0  ;;  %v590_v10 = vsel %vm417_vm0, %v429_v6, 0  ;;  %v424_v11 = vld [vmem:[%s366_s7 + $0x8] sm:$0xf] }
  0x12   : > { %1484 = vmatprep.subr.bf16.mxu0 %v1638_v0  ;;  %1490 = vmatprep.subr.bf16.mxu1 %v1638_v0  ;;  %v425_v12 = vld [vmem:[%s366_s7 + $0xc] sm:$0xf]  ;;  %409 = vst.msk [vmem:[#allocation2] sm:$0xff] %vm408_vm2, %v1640_v13  ;;  %410 = vst.msk [vmem:[#allocation2 + $0x8] sm:$0xff] %vm408_vm2, %v1640_v13  ;;  %v436_v15 = vand.u32 127, %v435_v14  ;;  %s1404_s10 = sshll.u32 %s1929_s21, 2 }
  0x13   : > { %411 = vst.msk [vmem:[#allocation2 + $0x10] sm:$0xff] %vm408_vm2, %v1640_v13  ;;  %412 = vst.msk [vmem:[#allocation2 + $0x18] sm:$0xff] %vm408_vm2, %v1640_v13  ;;  %v430_v61 = vld [vmem:[%s382_s13] sm:$0xf]  ;;  %v431_v1 = vld [vmem:[%s382_s13 + $0x4] sm:$0xf] }
  0x14   : > { %413 = vst.msk [vmem:[#allocation3] sm:$0xff] %vm408_vm2, %v1638_v0  ;;  %414 = vst.msk [vmem:[#allocation3 + $0x8] sm:$0xff] %vm408_vm2, %v1638_v0  ;;  %vm439_vm3 = vcmp.lt.s32.totalorder %v436_v15, 8  ;;  %v769_v63 = vsel %vm767_vm5, %v430_v61, 0  ;;  %v815_v2 = vsel %vm767_vm5, %v431_v1, 0  ;;  %v1584_v61 = vld [vmem:[%s1922_s5 + $0x18] sm:$0xff]  }
  0x15   : > { %415 = vst.msk [vmem:[#allocation3 + $0x10] sm:$0xff] %vm408_vm2, %v1638_v0  ;;  %416 = vst.msk [vmem:[#allocation3 + $0x18] sm:$0xff] %vm408_vm2, %v1638_v0  ;;  %v432_v3 = vld [vmem:[%s382_s13 + $0x8] sm:$0xf]  ;;  %v433_v5 = vld [vmem:[%s382_s13 + $0xc] sm:$0xf]  ;;  %s395_s13 = scalar_lea.vmem %s1921_s4, %s1404_s10 }
  0x16   : > { %v861_v4 = vsel %vm767_vm5, %v432_v3, 0  ;;  %v907_v6 = vsel %vm767_vm5, %v433_v5, 0  ;;  %s1405_s14 = sshll.u32 %s1929_s21, 3 }
  0x17   : > { %s402_s17 = scalar_lea.vmem %s1923_s6, %s1405_s14 }
  0x18   : > { %1475 = vmatmul.mubr.msk.bf16.vlgmr.msra.gmra.mxu0 %vm417_vm0, %v422_v7  ;;  %1481 = vmatmul.mubr.msk.bf16.vlgmr.msra.gmra.mxu1 %vm417_vm0, %v423_v8 }
  0x19   : > { %1485 = vmatpush3.bf16.xpose.msra.mxu0 %v544_v9  ;;  %1491 = vmatpush3.bf16.xpose.msra.mxu1 %v590_v10  ;;  %v1775_v46 = vld [vmem:[#allocation2] sm:$0xff]  ;;  %v1780_v49 = vld [vmem:[#allocation2 + $0x8] sm:$0xff] }
  0x1a   : > { %1486 = vmatprep.mubr.msk.bf16.mxu0 %vm1639_vm1, %v1638_v0  ;;  %1492 = vmatprep.mubr.msk.bf16.mxu1 %vm1639_vm1, %v1638_v0  ;;  %v1790_v53 = vld [vmem:[#allocation2 + $0x10] sm:$0xff]  ;;  %v1800_v57 = vld [vmem:[#allocation2 + $0x18] sm:$0xff] }
  0x1b   : > { %1496 = vmatprep.subr.bf16.mxu0 %v1638_v0  ;;  %1502 = vmatprep.subr.bf16.mxu1 %v1638_v0 }
  0x1c   : > { %v705_v45 = vld [vmem:[#allocation3 + $0x10] sm:$0xff] }
  0x20   : > { %1487 = vmatmul.mubr.msk.bf16.vlgmr.msra.gmra.mxu0 %vm417_vm0, %v424_v11  ;;  %1493 = vmatmul.mubr.msk.bf16.vlgmr.msra.gmra.mxu1 %vm417_vm0, %v425_v12 }
  0x21   : > { %1498 = vmatprep.mubr.msk.bf16.mxu0 %vm1639_vm1, %v1638_v0  ;;  %1504 = vmatprep.mubr.msk.bf16.mxu1 %vm1639_vm1, %v1638_v0 }
  0x22   : > { %1497 = vmatpush3.bf16.msra.mxu0 %v769_v63  ;;  %1503 = vmatpush3.bf16.msra.mxu1 %v815_v2 }
  0x23   : > { %1508 = vmatprep.subr.bf16.mxu0 %v1638_v0  ;;  %1514 = vmatprep.subr.bf16.mxu1 %v1638_v0 }
  0xd8   : > { %v488_v17 = vpop.f32.mrf.mxu0  ;;  %v534_v18 = vpop.f32.mrf.mxu1 }
  0xd9   : > { %v489_v19 = vadd.f32 %v1406_v16, %v488_v17  ;;  %v535_v20 = vadd.f32 %v1406_v16, %v534_v18 }
  0xda   : > { %v1476_v21 = vpop.f32.mrf.mxu0  ;;  %v1482_v22 = vpop.f32.mrf.mxu1 }
  0xdb   : > { %v1759_v23 = vsel %vm439_vm3, %v489_v19, -2e+30  ;;  %v1762_v24 = vsel %vm439_vm3, %v535_v20, -2e+30 }
  0xdc   : > { %v491_v25 = vpop.f32.mrf.mxu0  ;;  %v537_v26 = vpop.f32.mrf.mxu1  ;;  %v643_v27 = vsel %vm642_vm4, %v1759_v23, -inf  ;;  %v646_v30 = vsel %vm642_vm4, %v1762_v24, -inf }
  0xdd   : > { %644 = vmax.xlane.f32.xlu0 %v643_v27 }
  0xde   : > { %v1477_v28 = vpop.f32.mrf.mxu0  ;;  %v1483_v29 = vpop.f32.mrf.mxu1 }
  0xe0   : > { %v580_v31 = vpop.f32.mrf.mxu0  ;;  %v626_v32 = vpop.f32.mrf.mxu1 }
  0xe1   : > { %v581_v33 = vadd.f32 %v1406_v16, %v580_v31  ;;  %v627_v34 = vadd.f32 %v1406_v16, %v626_v32  ;;  %647 = vmax.xlane.f32.xlu0 %v646_v30 }
  0xe2   : > { %v1488_v35 = vpop.f32.mrf.mxu0  ;;  %v1494_v36 = vpop.f32.mrf.mxu1 }
  0xe3   : > { %v636_v37 = vsel %vm439_vm3, %v581_v33, -2e+30  ;;  %v1770_v38 = vsel %vm439_vm3, %v627_v34, -2e+30  ;;  %v703_v36 = vld [vmem:[#allocation3] sm:$0xff] }
  0xe4   : > { %v583_v39 = vpop.f32.mrf.mxu0  ;;  %v629_v40 = vpop.f32.mrf.mxu1  ;;  %v649_v41 = vsel %vm642_vm4, %v636_v37, -inf  ;;  %v652_v44 = vsel %vm642_vm4, %v1770_v38, -inf }
  0xe5   : > { %650 = vmax.xlane.f32.xlu1 %v649_v41  ;;  %v704_v40 = vld [vmem:[#allocation3 + $0x8] sm:$0xff] }
  0xe6   : > { %v1489_v42 = vpop.f32.mrf.mxu0  ;;  %v1495_v43 = vpop.f32.mrf.mxu1 }
  0xe9   : > { %653 = vmax.xlane.f32.xlu1 %v652_v44 }
 0x166   : > { %v645_v47 = vpop.xlane.xlu0 %644 }
 0x167   : > { %v1778_v48 = vmax.f32 %v1775_v46, %v645_v47 }
 0x169   : > { %v659_v50 = vsub.f32 %v1775_v46, %v1778_v48  ;;  %957 = vst.msk [vmem:[#allocation2] sm:$0xff] %vm408_vm2, %v1778_v48  ;;  %673 = vperm.xlu0 %1580, %v1778_v48  }
 0x16a   : > { %v648_v51 = vpop.xlane.xlu0 %647 }
 0x16b   : > { %v1788_v52 = vmax.f32 %v1780_v49, %v648_v51  ;;  %v663_v31 = vmul.f32 1.442695, %v659_v50  ;;  %v706_v50 = vld [vmem:[#allocation3 + $0x18] sm:$0xff] }
 0x16d   : > { %v660_v54 = vsub.f32 %v1780_v49, %v1788_v52  ;;  %958 = vst.msk [vmem:[#allocation2 + $0x8] sm:$0xff] %vm408_vm2, %v1788_v52  ;;  %678 = vperm.xlu1 %1581, %v1788_v52  }
 0x16e   : > { %v651_v55 = vpop.xlane.xlu1 %650 }
 0x16f   : > { %v1798_v56 = vmax.f32 %v1790_v53, %v651_v55  ;;  %v665_v32 = vmul.f32 1.442695, %v660_v54 }
 0x171   : > { %v661_v58 = vsub.f32 %v1790_v53, %v1798_v56  ;;  %959 = vst.msk [vmem:[#allocation2 + $0x10] sm:$0xff] %vm408_vm2, %v1798_v56  ;;  %683 = vperm.xlu1 %1581, %v1798_v56  }
 0x172   : > { %v654_v59 = vpop.xlane.xlu1 %653 }
 0x173   : > { %v1808_v60 = vmax.f32 %v1800_v57, %v654_v59  ;;  %v667_v33 = vmul.f32 1.442695, %v661_v58 }
 0x175   : > { %v662_v62 = vsub.f32 %v1800_v57, %v1808_v60  ;;  %960 = vst.msk [vmem:[#allocation2 + $0x18] sm:$0xff] %vm408_vm2, %v1808_v60  ;;  %688 = vperm.xlu1 %1581, %v1808_v60   ;;  %v1582_v57 = vld [vmem:[%s1922_s5 + $0x8] sm:$0xff]   ;;  %v1583_v60 = vld [vmem:[%s1922_s5] sm:$0xff]  }
 0x177   : > { %v669_v34 = vmul.f32 1.442695, %v662_v62  ;;  %v1585_v62 = vld [vmem:[%s1922_s5 + $0x10] sm:$0xff]  }
 0x1e4   : > { %v674_v7 = vpop.permute.xlu0 %673 }
 0x1e5   : > { %v691_v8 = vsub.f32 %v1759_v23, %v674_v7 }
 0x1e7   : > { %v695_v9 = vmul.f32 1.442695, %v691_v8 }
 0x1e8   : > { %v679_v10 = vpop.permute.xlu1 %678 }
 0x1e9   : > { %1590 = vpow2.f32 %v695_v9  ;;  %v692_v11 = vsub.f32 %v1762_v24, %v679_v10 }
 0x1eb   : > { %v697_v12 = vmul.f32 1.442695, %v692_v11 }
 0x1ec   : > { %v684_v13 = vpop.permute.xlu1 %683 }
 0x1ed   : > { %1592 = vpow2.f32 %v697_v12  ;;  %v693_v14 = vsub.f32 %v636_v37, %v684_v13 }
 0x1ef   : > { %v699_v15 = vmul.f32 1.442695, %v693_v14 }
 0x1f0   : > { %v689_v16 = vpop.permute.xlu1 %688 }
 0x1f1   : > { %1594 = vpow2.f32 %v699_v15  ;;  %v694_v17 = vsub.f32 %v1770_v38, %v689_v16 }
 0x1f3   : > { %v701_v18 = vmul.f32 1.442695, %v694_v17  ;;  %v732_v17 = vld [vmem:[#allocation4] sm:$0xff] }
 0x1f5   : > { %1596 = vpow2.f32 %v701_v18 }
 0x1f6   : > { %v1591_v19 = vpop.eup %1590  ;;  %1598 = vpow2.f32 %v663_v31 }
 0x1f7   : > { %v711_v20 = vsel %vm642_vm4, %v1591_v19, 0.0  ;;  %v760_v21 = vpack.c.bf16 %v1591_v19, %v1591_v19  ;;  %1600 = vpow2.f32 %v665_v32 }
 0x1f8   : > { %712 = vadd.xlane.f32.xlu1 %v711_v20  ;;  %1602 = vpow2.f32 %v667_v33 }
 0x1f9   : > { %1499 = vmatmul.mubr.msk.bf16.vlgmr.msra.gmra.mxu0 %vm642_vm4, %v760_v21  ;;  %1604 = vpow2.f32 %v669_v34  ;;  %v733_v21 = vld [vmem:[#allocation4 + $0x8] sm:$0xff] }
 0x1fa   : > { %v1593_v22 = vpop.eup %1592  ;;  %1509 = vmatpush3.bf16.msra.mxu0 %v861_v4  ;;  %1510 = vmatprep.mubr.msk.bf16.mxu0 %vm1639_vm1, %v1638_v0 }
 0x1fb   : > { %v714_v23 = vsel %vm642_vm4, %v1593_v22, 0.0  ;;  %v761_v24 = vpack.c.bf16 %v1593_v22, %v1593_v22  ;;  %1520 = vmatprep.subr.bf16.mxu0 %v1638_v0 }
 0x1fc   : > { %715 = vadd.xlane.f32.xlu0 %v714_v23 }
 0x1fd   : > { %1505 = vmatmul.mubr.msk.bf16.vlgmr.msra.gmra.mxu1 %vm642_vm4, %v761_v24 }
 0x1fe   : > { %v1595_v25 = vpop.eup %1594  ;;  %1515 = vmatpush3.bf16.msra.mxu1 %v907_v6  ;;  %1516 = vmatprep.mubr.msk.bf16.mxu1 %vm1639_vm1, %v1638_v0 }
 0x1ff   : > { %v717_v26 = vsel %vm642_vm4, %v1595_v25, 0.0  ;;  %v762_v27 = vpack.c.bf16 %v1595_v25, %v1595_v25  ;;  %1528 = vmatprep.subr.bf16.mxu1 %v1638_v0 }
 0x200   : > { %718 = vadd.xlane.f32.xlu1 %v717_v26 }
 0x201   : > { %1511 = vmatmul.mubr.msk.bf16.vlgmr.msra.gmra.mxu0 %vm642_vm4, %v762_v27 }
 0x202   : > { %v1597_v28 = vpop.eup %1596  ;;  %1524 = vmatprep.mubr.msk.bf16.mxu0 %vm1639_vm1, %v1638_v0  ;;  %1521 = vmatpush3.bf16.msra.mxu0 %v1582_v57 }
 0x203   : > { %v720_v29 = vsel %vm642_vm4, %v1597_v28, 0.0  ;;  %v763_v30 = vpack.c.bf16 %v1597_v28, %v1597_v28  ;;  %v1599_v35 = vpop.eup %1598  ;;  %1522 = vmatprep.subr.bf16.mxu0 %v1638_v0  ;;  %v735_v28 = vld [vmem:[#allocation4 + $0x18] sm:$0xff] }
 0x204   : > { %721 = vadd.xlane.f32.xlu1 %v720_v29  ;;  %v707_v37 = vmul.f32 %v1599_v35, %v703_v36  ;;  %v1601_v38 = vpop.eup %1600  ;;  %v734_v29 = vld [vmem:[#allocation4 + $0x10] sm:$0xff] }
 0x205   : > { %1517 = vmatmul.mubr.msk.bf16.vlgmr.msra.gmra.mxu1 %vm642_vm4, %v763_v30  ;;  %v708_v42 = vmul.f32 %v1601_v38, %v704_v40  ;;  %v1603_v43 = vpop.eup %1602 }
 0x206   : > { %1532 = vmatprep.mubr.msk.bf16.mxu1 %vm1639_vm1, %v1638_v0  ;;  %v709_v47 = vmul.f32 %v1603_v43, %v705_v45  ;;  %v1605_v48 = vpop.eup %1604  ;;  %1523 = vmatpush3.bf16.msra.mxu0 %v1583_v60  ;;  %v1588_v45 = vld [vmem:[%s1922_s5 + $0x20] sm:$0xff]  }
 0x207   : > { %v710_v53 = vmul.f32 %v1605_v48, %v706_v50  ;;  %1529 = vmatpush3.bf16.msra.mxu1 %v1584_v61  ;;  %1536 = vmatprep.subr.bf16.mxu0 %v1638_v0 }
 0x208   : > { %1530 = vmatprep.subr.bf16.mxu1 %v1638_v0 }
 0x20b   : > { %1531 = vmatpush3.bf16.msra.mxu1 %v1585_v62 }
 0x20c   : > { %1544 = vmatprep.subr.bf16.mxu1 %v1638_v0 }
 0x281   : > { %v713_v39 = vpop.xlane.xlu1 %712 }
 0x282   : > { %v723_v41 = vadd.f32 %v713_v39, %v707_v37  ;;  %v1586_v37 = vld [vmem:[%s1922_s5 + $0x28] sm:$0xff]  }
 0x284   : > { %728 = vst.msk [vmem:[#allocation3] sm:$0xff] %vm408_vm2, %v723_v41 }
 0x285   : > { %v716_v44 = vpop.xlane.xlu0 %715 }
 0x286   : > { %v724_v46 = vadd.f32 %v716_v44, %v708_v42  ;;  %v1587_v44 = vld [vmem:[%s1922_s5 + $0x38] sm:$0xff]  }
 0x288   : > { %729 = vst.msk [vmem:[#allocation3 + $0x8] sm:$0xff] %vm408_vm2, %v724_v46 }
 0x289   : > { %v719_v49 = vpop.xlane.xlu1 %718 }
 0x28a   : > { %v725_v51 = vadd.f32 %v719_v49, %v709_v47  ;;  %v1589_v47 = vld [vmem:[%s1922_s5 + $0x30] sm:$0xff]  }
 0x28b   : > { %v968_v52 = vld [vmem:[#allocation3] sm:$0xff] }
 0x28c   : > { %730 = vst.msk [vmem:[#allocation3 + $0x10] sm:$0xff] %vm408_vm2, %v725_v51  ;;  %974 = vperm.xlu1 %1581, %v968_v52  }
 0x28d   : > { %v722_v54 = vpop.xlane.xlu1 %721 }
 0x28e   : > { %v726_v55 = vadd.f32 %v722_v54, %v710_v53 }
 0x28f   : > { %v969_v56 = vld [vmem:[#allocation3 + $0x8] sm:$0xff] }
 0x290   : > { %731 = vst.msk [vmem:[#allocation3 + $0x18] sm:$0xff] %vm408_vm2, %v726_v55  ;;  %979 = vperm.xlu0 %1580, %v969_v56   ;;  %738 = vperm.xlu1 %1581, %v1599_v35  }
 0x293   : > { %v970_v58 = vld [vmem:[#allocation3 + $0x10] sm:$0xff] }
 0x294   : > { %743 = vperm.xlu1 %1581, %v1601_v38  }
 0x297   : > { %v971_v59 = vld [vmem:[#allocation3 + $0x18] sm:$0xff] }
 0x298   : > { %984 = vperm.xlu1 %1581, %v970_v58   ;;  %989 = vperm.xlu0 %1580, %v971_v59  }
 0x29c   : > { %748 = vperm.xlu1 %1581, %v1603_v43   ;;  %753 = vperm.xlu0 %1580, %v1605_v48  }
 0x2b9   : > { %v805_v63 = vpop.f32.mrf.mxu0 }
 0x2bb   : > { %v1500_v1 = vpop.f32.mrf.mxu0 }
 0x2bd   : > { %v808_v2 = vpop.f32.mrf.mxu0  ;;  %v851_v3 = vpop.f32.mrf.mxu1 }
 0x2bf   : > { %v1501_v4 = vpop.f32.mrf.mxu0  ;;  %v1506_v5 = vpop.f32.mrf.mxu1 }
 0x2c1   : > { %v854_v6 = vpop.f32.mrf.mxu1  ;;  %v897_v7 = vpop.f32.mrf.mxu0 }
 0x2c3   : > { %v1507_v8 = vpop.f32.mrf.mxu1  ;;  %v1512_v9 = vpop.f32.mrf.mxu0 }
 0x2c5   : > { %v900_v10 = vpop.f32.mrf.mxu0  ;;  %v943_v11 = vpop.f32.mrf.mxu1 }
 0x2c7   : > { %v1513_v12 = vpop.f32.mrf.mxu0  ;;  %v1518_v13 = vpop.f32.mrf.mxu1 }
 0x2c9   : > { %v946_v14 = vpop.f32.mrf.mxu1 }
 0x2cb   : > { %v1519_v15 = vpop.f32.mrf.mxu1 }
 0x307   : > { %v975_v16 = vpop.permute.xlu1 %974 }
 0x308   : > { %1606 = vrcp.f32 %v975_v16 }
 0x30b   : > { %v980_v18 = vpop.permute.xlu0 %979  ;;  %v739_v19 = vpop.permute.xlu1 %738 }
 0x30c   : > { %v756_v20 = vmul.f32 %v739_v19, %v732_v17  ;;  %1608 = vrcp.f32 %v980_v18 }
 0x30e   : > { %v949_v22 = vadd.f32 %v805_v63, %v756_v20 }
 0x30f   : > { %v744_v23 = vpop.permute.xlu1 %743 }
 0x310   : > { %953 = vst.msk [vmem:[#allocation4] sm:$0xff] %vm417_vm0, %v949_v22  ;;  %v757_v24 = vmul.f32 %v744_v23, %v733_v21 }
 0x312   : > { %v950_v25 = vadd.f32 %v851_v3, %v757_v24 }
 0x313   : > { %v990_v26 = vpop.permute.xlu0 %989  ;;  %v985_v27 = vpop.permute.xlu1 %984 }
 0x314   : > { %954 = vst.msk [vmem:[#allocation4 + $0x8] sm:$0xff] %vm417_vm0, %v950_v25  ;;  %1610 = vrcp.f32 %v990_v26 }
 0x315   : > { %1612 = vrcp.f32 %v985_v27  ;;  %v1607_v30 = vpop.eup %1606 }
 0x317   : > { %v754_v31 = vpop.permute.xlu0 %753  ;;  %v749_v32 = vpop.permute.xlu1 %748  ;;  %v964_v33 = vld [vmem:[#allocation4] sm:$0xff] }
 0x318   : > { %v759_v34 = vmul.f32 %v754_v31, %v735_v28  ;;  %v758_v35 = vmul.f32 %v749_v32, %v734_v29  ;;  %v993_v36 = vmul.f32 %v1607_v30, %v964_v33 }
 0x319   : > { %v1609_v41 = vpop.eup %1608 }
 0x31a   : > { %v952_v38 = vadd.f32 %v943_v11, %v759_v34  ;;  %v951_v39 = vadd.f32 %v897_v7, %v758_v35  ;;  %v1000_v40 = vpack.c.bf16 %v993_v36, %v993_v36 }
 0x31b   : > { %v965_v42 = vld [vmem:[#allocation4 + $0x8] sm:$0xff] }
 0x31c   : > { %956 = vst.msk [vmem:[#allocation4 + $0x18] sm:$0xff] %vm417_vm0, %v952_v38  ;;  %955 = vst.msk [vmem:[#allocation4 + $0x10] sm:$0xff] %vm417_vm0, %v951_v39  ;;  %1525 = vmatmul.mubr.msk.bf16.vlgmr.msra.gmra.mxu0 %vm417_vm0, %v1000_v40  ;;  %v995_v43 = vmul.f32 %v1609_v41, %v965_v42 }
 0x31d   : > { %1537 = vmatpush3.bf16.msra.mxu0 %v1586_v37  ;;  %1540 = vmatprep.mubr.msk.bf16.mxu0 %vm1639_vm1, %v1638_v0 }
 0x31e   : > { %v1001_v46 = vpack.c.bf16 %v995_v43, %v995_v43  ;;  %1538 = vmatprep.subr.bf16.mxu0 %v1638_v0 }
 0x320   : > { %1533 = vmatmul.mubr.msk.bf16.vlgmr.msra.gmra.mxu1 %vm417_vm0, %v1001_v46 }
 0x321   : > { %1545 = vmatpush3.bf16.msra.mxu1 %v1587_v44  ;;  %1539 = vmatpush3.bf16.msra.mxu0 %v1588_v45  ;;  %v1611_v48 = vpop.eup %1610 }
 0x322   : > { %1546 = vmatprep.subr.bf16.mxu1 %v1638_v0  ;;  %1548 = vmatprep.mubr.msk.bf16.mxu1 %vm1639_vm1, %v1638_v0  ;;  %v1613_v49 = vpop.eup %1612  ;;  %v1004_v0 = vld [vmem:[%s395_s13] sm:$0xf] }
 0x323   : > { %v966_v50 = vld [vmem:[#allocation4 + $0x10] sm:$0xff]  ;;  %v967_v51 = vld [vmem:[#allocation4 + $0x18] sm:$0xff]  ;;  %v1005_v60 = vunpack.c.l.bf16 %v1004_v0 }
 0x324   : > { %v997_v52 = vmul.f32 %v1613_v49, %v966_v50  ;;  %v999_v53 = vmul.f32 %v1611_v48, %v967_v51 }
 0x325   : > { %1547 = vmatpush3.bf16.msra.mxu1 %v1589_v47 }
 0x326   : > { %v1002_v54 = vpack.c.bf16 %v997_v52, %v997_v52  ;;  %v1003_v55 = vpack.c.bf16 %v999_v53, %v999_v53 }
 0x328   : > { %1541 = vmatmul.mubr.msk.bf16.vlgmr.msra.gmra.mxu0 %vm417_vm0, %v1002_v54  ;;  %1549 = vmatmul.mubr.msk.bf16.vlgmr.msra.gmra.mxu1 %vm417_vm0, %v1003_v55 }
 0x3dc   : > { %v1059_v56 = vpop.f32.mrf.mxu0 }
 0x3dd   : > { %v1065_v1 = vadd.f32 %v1059_v56, %v1005_v60 }
 0x3de   : > { %v1526_v57 = vpop.f32.mrf.mxu0 }
 0x3e0   : > { %v1062_v58 = vpop.f32.mrf.mxu0  ;;  %v1120_v59 = vpop.f32.mrf.mxu1 }
 0x3e1   : > { %v1126_v3 = vadd.f32 %v1120_v59, %v1065_v1 }
 0x3e2   : > { %v1527_v61 = vpop.f32.mrf.mxu0  ;;  %v1534_v62 = vpop.f32.mrf.mxu1 }
 0x3e4   : > { %v1123_v63 = vpop.f32.mrf.mxu1 }
 0x3e6   : > { %v1535_v2 = vpop.f32.mrf.mxu1 }
 0x3e8   : > { %v1181_v4 = vpop.f32.mrf.mxu0  ;;  %v1242_v5 = vpop.f32.mrf.mxu1 }
 0x3e9   : > { %v1187_v6 = vadd.f32 %v1181_v4, %v1126_v3 }
 0x3ea   : > { %v1542_v7 = vpop.f32.mrf.mxu0  ;;  %v1550_v8 = vpop.f32.mrf.mxu1 }
 0x3eb   : > { %v1248_v9 = vadd.f32 %v1242_v5, %v1187_v6 }
 0x3ec   : > { %v1184_v10 = vpop.f32.mrf.mxu0  ;;  %v1245_v11 = vpop.f32.mrf.mxu1 }
 0x3ed   : > { %1249 = vst [vmem:[%s402_s17] sm:$0xff] %v1248_v9 }
 0x3ee   : > { %v1543_v12 = vpop.f32.mrf.mxu0  ;;  %v1551_v13 = vpop.f32.mrf.mxu1 }
 0x3ef PF: > { %s16_s23 = sadd.s32 1, %s1636_s23   ;;  %s1924_s21 = smov %s1632_s22 }
 0x3f0   : > { %p13_p5 = scmp.ge.s32.totalorder %s16_s23, 4   ;;  %s1925_s22 = smov %s1927_s24 }
 0x3f2   :  { %15 = sbr.rel (!%p13_p5) target bundleno = 2 (0x2), region = 97 }

</bundles_post_ra>
